<compile_context>
chip_gen: v5e
topology: v5e:2x2
jax: 0.10.0
libtpu: 0.0.40
codegen_flags: <defaults>
</compile_context>

<pallas_src>
import jax
import jax.numpy as jnp
from jax.experimental import pallas as pl
from jax.experimental.pallas import tpu as pltpu


def _round_up(x, m):
    return ((x + m - 1) // m) * m


def _device_caps():
    """(row-tile cap, vmem_limit_bytes, tensorcores-per-chip) by TPU generation."""
    kind = ""
    try:
        kind = jax.devices()[0].device_kind.lower()
    except Exception:
        pass
    if "v7" in kind:
        # 64 MiB VMEM / 2 TensorCores: smaller tile + headroom, split across cores.
        return 8192, 40 << 20, 2
    if "v5" in kind or "v6" in kind:
        # 128 MiB VMEM / 1 TensorCore: go big, never force-split.
        return 16384, 80 << 20, 1
    # Unknown generation: conservative.
    return 8192, 40 << 20, 1


def _choose_tile(n, tm_cap, num_cores):
    """Pick the row tile: as large as allowed, multiple of 128.

    Only on multi-TensorCore chips (v7x) do we shrink the tile so each core
    gets >=2 grid steps (lets the auto-pipeline hide the X DMA per core)."""
    n128 = _round_up(max(n, 1), 128)
    tm = min(tm_cap, n128)
    if num_cores >= 2 and n128 >= 2 * num_cores * 1024:
        target_steps = 2 * num_cores
        if pl.cdiv(n128, tm) < target_steps:
            tm = _round_up(pl.cdiv(n128, target_steps), 128)
    return max(128, tm)


def _make_kernel(n_layers):
    n_mid = n_layers - 2

    def kernel(*refs):
        if n_mid > 0:
            (x_ref, w1_ref, b1_ref, w2_ref, b2_ref,
             w3_ref, b3_ref, out_ref) = refs
        else:
            x_ref, w1_ref, b1_ref, w3_ref, b3_ref, out_ref = refs

        # ---- layer 1: relu(X @ W1 + b1); in-kernel bf16 cast, f32 accumulation
        x = x_ref[...].astype(jnp.bfloat16)
        hid = jnp.dot(x, w1_ref[...], preferred_element_type=jnp.float32)
        hid = jnp.maximum(hid + b1_ref[...], 0.0)

        # ---- middle layers: (n_layers - 2) repeats of relu(hid @ W2 + b2) ----
        if n_mid > 0:
            w2 = w2_ref[...]          # hoisted out of the loop (no CSE otherwise)
            b2 = b2_ref[...]

            def mid(h):
                h = jnp.dot(h.astype(jnp.bfloat16), w2,
                            preferred_element_type=jnp.float32)
                return jnp.maximum(h + b2, 0.0)

            if n_mid <= 2:
                for _ in range(n_mid):
                    hid = mid(hid)
            else:
                # Deep configs: fori_loop bounds live ranges of the big hid tiles.
                hid = jax.lax.fori_loop(0, n_mid, lambda _, h: mid(h), hid,
                                        unroll=False)

        # ---- output layer + sigmoid (lane-dense (1, tm) logit row) ----
        logit = jax.lax.dot_general(
            w3_ref[...], hid.astype(jnp.bfloat16),
            dimension_numbers=(((1,), (1,)), ((), ())),
            preferred_element_type=jnp.float32)
        logit = logit + b3_ref[0, 0]            # scalar bias from SMEM
        out_ref[...] = jax.nn.sigmoid(logit).astype(out_ref.dtype)

    return kernel


def link_prediction_forward(x, params, *, n_layers=2, tm=None):
    """x: (N, in_feats). params: weights stored as (in, out); w3 as (hid, 1).

    Returns sigmoid predictions of shape (N, 1), float32.
    """
    N, in_feats = x.shape
    hid_feats = params["w1"].shape[1]

    tm_cap, vmem_limit, num_cores = _device_caps()
    if tm is None:
        tm = _choose_tile(N, tm_cap, num_cores)
    assert tm % 128 == 0, "row tile must be a multiple of 128"
    grid = pl.cdiv(N, tm)

    # Weights are tiny: cast to bf16 at the boundary (negligible HBM traffic).
    # X is streamed as-is and cast inside the kernel (no extra HBM pass).
    w1 = params["w1"].astype(jnp.bfloat16)
    b1 = params["b1"].reshape(1, hid_feats).astype(jnp.float32)
    w3 = params["w3"].reshape(1, hid_feats).astype(jnp.bfloat16)   # row vector
    b3 = params["b3"].reshape(1, 1).astype(jnp.float32)            # scalar, SMEM

    operands = [x, w1, b1]
    in_specs = [
        pl.BlockSpec((tm, in_feats), lambda i: (i, 0)),            # X row tile
        pl.BlockSpec((in_feats, hid_feats), lambda i: (0, 0)),     # W1
        pl.BlockSpec((1, hid_feats), lambda i: (0, 0)),            # b1
    ]
    weight_bytes = w1.size * 2 + b1.size * 4 + w3.size * 2 + 4
    if n_layers > 2:  # only ship w2/b2 when they are actually used
        w2 = params["w2"].astype(jnp.bfloat16)
        b2 = params["b2"].reshape(1, hid_feats).astype(jnp.float32)
        operands += [w2, b2]
        in_specs += [
            pl.BlockSpec((hid_feats, hid_feats), lambda i: (0, 0)),  # W2
            pl.BlockSpec((1, hid_feats), lambda i: (0, 0)),          # b2
        ]
        weight_bytes += w2.size * 2 + b2.size * 4
    operands += [w3, b3]
    in_specs += [
        pl.BlockSpec((1, hid_feats), lambda i: (0, 0)),            # w3 (row)
        pl.BlockSpec(memory_space=pltpu.MemorySpace.SMEM),         # b3 scalar
    ]

    grid_spec = pltpu.PrefetchScalarGridSpec(
        num_scalar_prefetch=0,
        grid=(grid,),
        in_specs=in_specs,
        out_specs=pl.BlockSpec((1, tm), lambda i: (0, i)),         # lane-dense
    )

    n_mid = max(n_layers - 2, 0)
    cost = pl.CostEstimate(
        flops=2 * N * (in_feats * hid_feats + n_mid * hid_feats * hid_feats
                       + hid_feats),
        transcendentals=N,                                         # sigmoid
        bytes_accessed=N * in_feats * x.dtype.itemsize + N * 4 + weight_bytes,
    )

    out_row = pl.pallas_call(
        _make_kernel(n_layers),
        out_shape=jax.ShapeDtypeStruct((1, N), jnp.float32),
        grid_spec=grid_spec,
        compiler_params=pltpu.CompilerParams(
            dimension_semantics=("parallel",),
            vmem_limit_bytes=vmem_limit),
        cost_estimate=cost,
    )(*operands)

    return out_row.reshape(N, 1)


def _reference_forward(x, params, n_layers=2):
    """Pure-JAX reference matching the kernel numerics (bf16 matmuls, f32 acc)."""
    hid = jnp.dot(x.astype(jnp.bfloat16), params["w1"].astype(jnp.bfloat16),
                  preferred_element_type=jnp.float32) + params["b1"]
    hid = jnp.maximum(hid, 0.0)
    for _ in range(n_layers - 2):
        hid = jnp.dot(hid.astype(jnp.bfloat16),
                      params["w2"].astype(jnp.bfloat16),
                      preferred_element_type=jnp.float32) + params["b2"]
        hid = jnp.maximum(hid, 0.0)
    logit = jnp.dot(hid.astype(jnp.bfloat16),
                    params["w3"].astype(jnp.bfloat16),
                    preferred_element_type=jnp.float32) + params["b3"]
    return jax.nn.sigmoid(logit)


def init_params(key, in_feats, hid_feats):
    """Deterministic synthetic init (shapes follow nn.Linear; stored as (in, out))."""
    k1, k2, k3, k4, k5, k6 = jax.random.split(key, 6)
    s1 = 1.0 / jnp.sqrt(in_feats)
    s2 = 1.0 / jnp.sqrt(hid_feats)
    return {
        "w1": jax.random.uniform(k1, (in_feats, hid_feats), jnp.float32, -s1, s1),
        "b1": jax.random.uniform(k2, (1, hid_feats), jnp.float32, -s1, s1),
        "w2": jax.random.uniform(k3, (hid_feats, hid_feats), jnp.float32, -s2, s2),
        "b2": jax.random.uniform(k4, (1, hid_feats), jnp.float32, -s2, s2),
        "w3": jax.random.uniform(k5, (hid_feats, 1), jnp.float32, -s2, s2),
        "b3": jax.random.uniform(k6, (1, 1), jnp.float32, -s2, s2),
    }


if __name__ == "__main__":
    key = jax.random.PRNGKey(0)
    kx, kp = jax.random.split(key)

    N, in_feats, hid_feats = 1024, 32, 32
    x = jax.random.normal(kx, (N, in_feats), dtype=jnp.float32)
    params = init_params(kp, in_feats, hid_feats)

    # default config (n_layers=2), batch fits in one tile
    y = link_prediction_forward(x, params, n_layers=2)
    y = jax.block_until_ready(y)
    y_ref = _reference_forward(x, params, n_layers=2)
    assert y.shape == (N, 1)
    assert jnp.allclose(y, y_ref, atol=2e-3, rtol=2e-3), float(
        jnp.max(jnp.abs(y - y_ref)))

    # deeper MLP + ragged batch (middle layer + masked partial last block)
    n_tail = 777
    y3 = link_prediction_forward(x[:n_tail], params, n_layers=3)
    y3 = jax.block_until_ready(y3)
    y3_ref = _reference_forward(x[:n_tail], params, n_layers=3)
    assert y3.shape == (n_tail, 1)
    assert jnp.allclose(y3, y3_ref, atol=2e-3, rtol=2e-3), float(
        jnp.max(jnp.abs(y3 - y3_ref)))

    # multi-step grid with a non-tile-aligned tail (forces a small tile so the
    # grid has several steps even on single-core chips)
    n_big = 20000
    xb = jax.random.normal(jax.random.PRNGKey(1), (n_big, in_feats),
                           dtype=jnp.float32)
    yb = link_prediction_forward(xb, params, n_layers=2, tm=4096)
    yb = jax.block_until_ready(yb)
    yb_ref = _reference_forward(xb, params, n_layers=2)
    assert yb.shape == (n_big, 1)
    assert jnp.allclose(yb, yb_ref, atol=2e-3, rtol=2e-3), float(
        jnp.max(jnp.abs(yb - yb_ref)))

    print("KERNEL_OK")
</pallas_src>

<mosaic_0001>
module attributes {stable_mosaic.version = 11 : i64} {
  func.func @kernel(%arg0: i32, %arg1: memref<1024x32xf32, #tpu.memory_space<vmem>>, %arg2: memref<32x32xbf16, #tpu.memory_space<vmem>>, %arg3: memref<1x32xf32, #tpu.memory_space<vmem>>, %arg4: memref<1x32xbf16, #tpu.memory_space<vmem>>, %arg5: memref<1x1xf32, #tpu.memory_space<smem>>, %arg6: memref<1x1024xf32, #tpu.memory_space<vmem>>) attributes {dimension_semantics = [#tpu.dimension_semantics<parallel>], iteration_bounds = array<i64: 1>, scalar_prefetch = 0 : i64, scratch_operands = 0 : i64, tpu.core_type = #tpu.core_type<tc>, window_params = [{transform_indices = @transform_0, window_bounds = array<i64: 1024, 32>}, {pipeline_mode = #tpu.pipeline_mode<synchronous>, transform_indices = @transform_1, window_bounds = array<i64: 32, 32>}, {pipeline_mode = #tpu.pipeline_mode<synchronous>, transform_indices = @transform_2, window_bounds = array<i64: 1, 32>}, {pipeline_mode = #tpu.pipeline_mode<synchronous>, transform_indices = @transform_3, window_bounds = array<i64: 1, 32>}, {transform_indices = @transform_4, window_bounds = array<i64: 1, 1>}, {transform_indices = @transform_5, window_bounds = array<i64: 1, 1024>}]} {
    %c0 = arith.constant 0 : index
    %c0_0 = arith.constant 0 : index
    %0 = vector.load %arg1[%c0, %c0_0] : memref<1024x32xf32, #tpu.memory_space<vmem>>, vector<1024x32xf32>
    %1 = arith.truncf %0 : vector<1024x32xf32> to vector<1024x32xbf16>
    %c0_1 = arith.constant 0 : index
    %c0_2 = arith.constant 0 : index
    %2 = vector.load %arg2[%c0_1, %c0_2] : memref<32x32xbf16, #tpu.memory_space<vmem>>, vector<32x32xbf16>
    %cst = arith.constant dense<0.000000e+00> : vector<1024x32xf32>
    %3 = tpu.matmul %1, %2, %cst {dimension_numbers = #tpu.dot_dimension_numbers<[1], [0], [0], [1], [0, 0, 1, 1], [], []>} : vector<1024x32xbf16>, vector<32x32xbf16>, vector<1024x32xf32> -> vector<1024x32xf32>
    %c0_3 = arith.constant 0 : index
    %c0_4 = arith.constant 0 : index
    %4 = vector.load %arg3[%c0_3, %c0_4] : memref<1x32xf32, #tpu.memory_space<vmem>>, vector<1x32xf32>
    %5 = vector.broadcast %4 : vector<1x32xf32> to vector<1024x32xf32>
    %6 = arith.addf %3, %5 : vector<1024x32xf32>
    %cst_5 = arith.constant 0.000000e+00 : f32
    %7 = vector.broadcast %cst_5 : f32 to vector<1024x32xf32>
    %8 = arith.maximumf %6, %7 : vector<1024x32xf32>
    %c0_6 = arith.constant 0 : index
    %c0_7 = arith.constant 0 : index
    %9 = vector.load %arg4[%c0_6, %c0_7] : memref<1x32xbf16, #tpu.memory_space<vmem>>, vector<1x32xbf16>
    %10 = arith.truncf %8 : vector<1024x32xf32> to vector<1024x32xbf16>
    %cst_8 = arith.constant dense<0.000000e+00> : vector<1x1024xf32>
    %11 = tpu.matmul %9, %10, %cst_8 {dimension_numbers = #tpu.dot_dimension_numbers<[1], [1], [0], [0], [0, 0, 1, 0], [], []>} : vector<1x32xbf16>, vector<1024x32xbf16>, vector<1x1024xf32> -> vector<1x1024xf32>
    %c0_9 = arith.constant 0 : index
    %c0_10 = arith.constant 0 : index
    %12 = memref.load %arg5[%c0_9, %c0_10] : memref<1x1xf32, #tpu.memory_space<smem>>
    %13 = vector.broadcast %12 : f32 to vector<1x1024xf32>
    %14 = arith.addf %11, %13 : vector<1x1024xf32>
    %15 = arith.negf %14 : vector<1x1024xf32>
    %16 = math.exp %15 : vector<1x1024xf32>
    %cst_11 = arith.constant 1.000000e+00 : f32
    %17 = vector.broadcast %cst_11 : f32 to vector<1x1024xf32>
    %18 = arith.addf %17, %16 : vector<1x1024xf32>
    %19 = arith.divf %17, %18 : vector<1x1024xf32>
    %c0_12 = arith.constant 0 : index
    %c0_13 = arith.constant 0 : index
    %20 = vector.load %arg6[%c0_12, %c0_13] : memref<1x1024xf32, #tpu.memory_space<vmem>>, vector<1x1024xf32>
    tpu.vector_store %arg6[%c0_12, %c0_13], %19 {strides = array<i32>} : memref<1x1024xf32, #tpu.memory_space<vmem>>, vector<1x1024xf32>,
    return
  }
  func.func @transform_0(%arg0: i32) -> (i32, i32) {
    %c0_i32 = arith.constant 0 : i32
    %c0_i32_0 = arith.constant 0 : i32
    return %arg0, %c0_i32 : i32, i32
  }
  func.func @transform_1(%arg0: i32) -> (i32, i32) {
    %c0_i32 = arith.constant 0 : i32
    %c0_i32_0 = arith.constant 0 : i32
    %c0_i32_1 = arith.constant 0 : i32
    return %c0_i32, %c0_i32_0 : i32, i32
  }
  func.func @transform_2(%arg0: i32) -> (i32, i32) {
    %c0_i32 = arith.constant 0 : i32
    %c0_i32_0 = arith.constant 0 : i32
    %c0_i32_1 = arith.constant 0 : i32
    return %c0_i32, %c0_i32_0 : i32, i32
  }
  func.func @transform_3(%arg0: i32) -> (i32, i32) {
    %c0_i32 = arith.constant 0 : i32
    %c0_i32_0 = arith.constant 0 : i32
    %c0_i32_1 = arith.constant 0 : i32
    return %c0_i32, %c0_i32_0 : i32, i32
  }
  func.func @transform_4(%arg0: i32) -> (i32, i32) {
    %c0_i32 = arith.constant 0 : i32
    %c0_i32_0 = arith.constant 0 : i32
    %c0_i32_1 = arith.constant 0 : i32
    return %c0_i32, %c0_i32_0 : i32, i32
  }
  func.func @transform_5(%arg0: i32) -> (i32, i32) {
    %c0_i32 = arith.constant 0 : i32
    %c0_i32_0 = arith.constant 0 : i32
    return %c0_i32, %arg0 : i32, i32
  }
}

</mosaic_0001>

<bundles_post_ra>
// kernel: tpu_custom_call.1
= control target key start
LH: loop header
LB: loop body
LE: loop exit
PB: predicated region body
PF: predicated region fallthrough
CT: control target
= control target key end

     0   :  { %s2644_s0 = inlined_call_operand.vmem [shape: f32[1024,32], index: 0, kind: input, shape index: {}]   ;;  %s2645_s1 = inlined_call_operand.vmem [shape: bf16[32,32], index: 1, kind: input, shape index: {}]   ;;  %s2646_s2 = inlined_call_operand.vmem [shape: f32[1,32], index: 2, kind: input, shape index: {}]   ;;  %s2647_s3 = inlined_call_operand.vmem [shape: bf16[1,32], index: 3, kind: input, shape index: {}]   ;;  %s2648_s4 = inlined_call_operand.<no memory space> [shape: f32[1,1], index: 4, kind: input, shape index: {}]   ;;  %s2649_s5 = inlined_call_operand.hbm [shape: f32[1,1024], index: 5, kind: output, shape index: {}]  }
   0x1   :  { %v1539_v0 = vld [vmem:[%s2645_s1 + $0x8] sm:$0xff]  ;;  %v1538_v1 = vld [vmem:[%s2645_s1] sm:$0xff] }
   0x2   :  { %434 = vmatpush.bf16.msra.mxu0 %v1539_v0  ;;  %v23_v2 = vld [vmem:[%s2644_s0] sm:$0xff]  ;;  %v24_v3 = vld [vmem:[%s2644_s0 + $0x8] sm:$0xff]  ;;  %1540 = vmatpush.bf16.msra.mxu1 %v1539_v0 }
   0x3   :  { %1542 = vmatpush.bf16.msra.mxu3 %v1539_v0  ;;  %1541 = vmatpush.bf16.msra.mxu2 %v1539_v0 }
   0x4   :  { %11 = vsyncpa [#allocation4], 0  ;;  %v151_v4 = vpack.c.bf16 %v24_v3, %v23_v2  ;;  %vm235_vm0 = vcmask 261120   ;;  %v25_v5 = vld [vmem:[%s2644_s0 + $0x10] sm:$0xff]  ;;  %v26_v6 = vld [vmem:[%s2644_s0 + $0x18] sm:$0xff]  ;;  %vm1418_vm9 = vcmask 1040384  }
   0x5   :  { %v152_v7 = vpack.c.bf16 %v26_v6, %v25_v5  ;;  %v71_v8 = vld [vmem:[%s2644_s0 + $0x180] sm:$0xff]  ;;  %v72_v9 = vld [vmem:[%s2644_s0 + $0x188] sm:$0xff]  ;;  %v73_v14 = vld [vmem:[%s2644_s0 + $0x190] sm:$0xff]  ;;  %s1441_s25 = sshll.u32 %s2649_s5, 4  ;;  %s1442_s25 = int_to_ptr.hbm [resolvable:$true] %s1441_s25 }
   0x6   :  { %435 = vmatpush.bf16.msra.mxu0 %v1538_v1  ;;  %1543 = vmatpush.bf16.msra.mxu1 %v1538_v1  ;;  %v175_v10 = vpack.c.bf16 %v72_v9, %v71_v8  ;;  %v27_v11 = vld [vmem:[%s2644_s0 + $0x20] sm:$0xff]  ;;  %v28_v12 = vld [vmem:[%s2644_s0 + $0x28] sm:$0xff]  ;;  %v74_v15 = vld [vmem:[%s2644_s0 + $0x198] sm:$0xff] }
   0x7   :  { %1545 = vmatpush.bf16.msra.mxu3 %v1538_v1  ;;  %1544 = vmatpush.bf16.msra.mxu2 %v1538_v1  ;;  %v153_v13 = vpack.c.bf16 %v28_v12, %v27_v11  ;;  %v176_v16 = vpack.c.bf16 %v74_v15, %v73_v14  ;;  %v29_v17 = vld [vmem:[%s2644_s0 + $0x30] sm:$0xff]  ;;  %v30_v18 = vld [vmem:[%s2644_s0 + $0x38] sm:$0xff]  ;;  %v115_v19 = vld [vmem:[%s2644_s0 + $0x2e0] sm:$0xff] }
   0x8   :  { %v116_v20 = vld [vmem:[%s2644_s0 + $0x2e8] sm:$0xff]  ;;  %v154_v22 = vpack.c.bf16 %v30_v18, %v29_v17  ;;  %v75_v23 = vld [vmem:[%s2644_s0 + $0x1a0] sm:$0xff]  ;;  %v117_v28 = vld [vmem:[%s2644_s0 + $0x2f0] sm:$0xff] }
   0x9   :  { %1458 = vmatmul.msk.bf16.vlgmr.msra.gmra.mxu0 %vm235_vm0, %v151_v4  ;;  %1482 = vmatmul.msk.bf16.vlgmr.msra.gmra.mxu1 %vm235_vm0, %v175_v10  ;;  %v197_v21 = vpack.c.bf16 %v116_v20, %v115_v19  ;;  %v76_v24 = vld [vmem:[%s2644_s0 + $0x1a8] sm:$0xff]  ;;  %v31_v26 = vld [vmem:[%s2644_s0 + $0x40] sm:$0xff]  ;;  %v118_v29 = vld [vmem:[%s2644_s0 + $0x2f8] sm:$0xff] }
   0xa   :  { %v177_v25 = vpack.c.bf16 %v76_v24, %v75_v23  ;;  %v32_v27 = vld [vmem:[%s2644_s0 + $0x48] sm:$0xff]  ;;  %v198_v30 = vpack.c.bf16 %v118_v29, %v117_v28  ;;  %v77_v32 = vld [vmem:[%s2644_s0 + $0x1b0] sm:$0xff]  ;;  %v78_v33 = vld [vmem:[%s2644_s0 + $0x1b8] sm:$0xff] }
   0xb   :  { %1504 = vmatmul.msk.bf16.vlgmr.msra.gmra.mxu3 %vm235_vm0, %v197_v21  ;;  %v155_v31 = vpack.c.bf16 %v32_v27, %v31_v26  ;;  %v178_v34 = vpack.c.bf16 %v78_v33, %v77_v32  ;;  %v33_v35 = vld [vmem:[%s2644_s0 + $0x50] sm:$0xff]  ;;  %v34_v36 = vld [vmem:[%s2644_s0 + $0x58] sm:$0xff]  ;;  %v119_v37 = vld [vmem:[%s2644_s0 + $0x300] sm:$0xff] }
   0xc   :  { %v120_v38 = vld [vmem:[%s2644_s0 + $0x308] sm:$0xff]  ;;  %v156_v40 = vpack.c.bf16 %v34_v36, %v33_v35  ;;  %v79_v41 = vld [vmem:[%s2644_s0 + $0x1c0] sm:$0xff]  ;;  %v121_v46 = vld [vmem:[%s2644_s0 + $0x310] sm:$0xff] }
   0xd   :  { %v199_v39 = vpack.c.bf16 %v120_v38, %v119_v37  ;;  %v80_v42 = vld [vmem:[%s2644_s0 + $0x1c8] sm:$0xff]  ;;  %v35_v44 = vld [vmem:[%s2644_s0 + $0x60] sm:$0xff]  ;;  %v122_v47 = vld [vmem:[%s2644_s0 + $0x318] sm:$0xff] }
   0xe   :  { %v179_v43 = vpack.c.bf16 %v80_v42, %v79_v41  ;;  %v36_v45 = vld [vmem:[%s2644_s0 + $0x68] sm:$0xff]  ;;  %v200_v48 = vpack.c.bf16 %v122_v47, %v121_v46  ;;  %v81_v50 = vld [vmem:[%s2644_s0 + $0x1d0] sm:$0xff]  ;;  %v82_v51 = vld [vmem:[%s2644_s0 + $0x1d8] sm:$0xff] }
   0xf   :  { %v157_v49 = vpack.c.bf16 %v36_v45, %v35_v44  ;;  %v180_v52 = vpack.c.bf16 %v82_v51, %v81_v50  ;;  %v37_v53 = vld [vmem:[%s2644_s0 + $0x70] sm:$0xff]  ;;  %v38_v54 = vld [vmem:[%s2644_s0 + $0x78] sm:$0xff]  ;;  %v123_v55 = vld [vmem:[%s2644_s0 + $0x320] sm:$0xff] }
  0x10   :  { %v124_v56 = vld [vmem:[%s2644_s0 + $0x328] sm:$0xff]  ;;  %v158_v58 = vpack.c.bf16 %v38_v54, %v37_v53  ;;  %v83_v59 = vld [vmem:[%s2644_s0 + $0x1e0] sm:$0xff]  ;;  %v125_v0 = vld [vmem:[%s2644_s0 + $0x330] sm:$0xff] }
  0x11   :  { %v201_v57 = vpack.c.bf16 %v124_v56, %v123_v55  ;;  %v84_v60 = vld [vmem:[%s2644_s0 + $0x1e8] sm:$0xff]  ;;  %v39_v62 = vld [vmem:[%s2644_s0 + $0x80] sm:$0xff]  ;;  %v126_v1 = vld [vmem:[%s2644_s0 + $0x338] sm:$0xff] }
  0x12   :  { %v181_v61 = vpack.c.bf16 %v84_v60, %v83_v59  ;;  %v40_v63 = vld [vmem:[%s2644_s0 + $0x88] sm:$0xff]  ;;  %v202_v2 = vpack.c.bf16 %v126_v1, %v125_v0  ;;  %v1800_v5 = vld [vmem:[%s2646_s2] ss:$0 sm:$0xff]  ;;  %v85_v9 = vld [vmem:[%s2644_s0 + $0x1f0] sm:$0xff] }
  0x13   :  { %v159_v3 = vpack.c.bf16 %v40_v63, %v39_v62  ;;  %v86_v10 = vld [vmem:[%s2644_s0 + $0x1f8] sm:$0xff]  ;;  %v41_v14 = vld [vmem:[%s2644_s0 + $0x90] sm:$0xff]  ;;  %v128_v17 = vld [vmem:[%s2644_s0 + $0x348] sm:$0xff] }
  0x14   :  { %v182_v11 = vpack.c.bf16 %v86_v10, %v85_v9  ;;  %v42_v15 = vld [vmem:[%s2644_s0 + $0x98] sm:$0xff]  ;;  %v43_v28 = vld [vmem:[%s2644_s0 + $0xa0] sm:$0xff]  ;;  %v44_v29 = vld [vmem:[%s2644_s0 + $0xa8] sm:$0xff] }
  0x15   :  { %v160_v20 = vpack.c.bf16 %v42_v15, %v41_v14  ;;  %v46_v44 = vld [vmem:[%s2644_s0 + $0xb8] sm:$0xff]  ;;  %v131_v45 = vld [vmem:[%s2644_s0 + $0x360] sm:$0xff]  ;;  %v132_v46 = vld [vmem:[%s2644_s0 + $0x368] sm:$0xff] }
  0x16   :  { %v205_v47 = vpack.c.bf16 %v132_v46, %v131_v45  ;;  %v47_v60 = vld [vmem:[%s2644_s0 + $0xc0] sm:$0xff]  ;;  %v133_v62 = vld [vmem:[%s2644_s0 + $0x370] sm:$0xff]  ;;  %v134_v63 = vld [vmem:[%s2644_s0 + $0x378] sm:$0xff] }
  0x17   :  { %v206_v1 = vpack.c.bf16 %v134_v63, %v133_v62  ;;  %v50_v14 = vld [vmem:[%s2644_s0 + $0xd8] sm:$0xff]  ;;  %v135_v15 = vld [vmem:[%s2644_s0 + $0x380] sm:$0xff] }
  0x18   :  { %v90_v62 = vld [vmem:[%s2644_s0 + $0x218] sm:$0xff] }
  0x19   :  { %1459 = vmatmul.msk.bf16.gmra.mxu0 %vm235_vm0, %v152_v7  ;;  %1483 = vmatmul.msk.bf16.gmra.mxu1 %vm235_vm0, %v176_v16  ;;  %v127_v16 = vld [vmem:[%s2644_s0 + $0x340] sm:$0xff] }
  0x1a   :  { %v203_v18 = vpack.c.bf16 %v128_v17, %v127_v16  ;;  %v136_v16 = vld [vmem:[%s2644_s0 + $0x388] sm:$0xff] }
  0x1b   :  { %1505 = vmatmul.msk.bf16.gmra.mxu3 %vm235_vm0, %v198_v30  ;;  %v129_v30 = vld [vmem:[%s2644_s0 + $0x350] sm:$0xff] }
  0x29   :  { %1460 = vmatmul.msk.bf16.gmra.mxu0 %vm235_vm0, %v153_v13  ;;  %1484 = vmatmul.msk.bf16.gmra.mxu1 %vm235_vm0, %v177_v25 }
  0x2b   :  { %1506 = vmatmul.msk.bf16.gmra.mxu3 %vm235_vm0, %v199_v39 }
  0x39   :  { %1461 = vmatmul.msk.bf16.gmra.mxu0 %vm235_vm0, %v154_v22  ;;  %1485 = vmatmul.msk.bf16.gmra.mxu1 %vm235_vm0, %v178_v34  ;;  %v161_v34 = vpack.c.bf16 %v44_v29, %v43_v28  ;;  %v51_v28 = vld [vmem:[%s2644_s0 + $0xe0] sm:$0xff]  ;;  %v52_v29 = vld [vmem:[%s2644_s0 + $0xe8] sm:$0xff] }
  0x3b   :  { %1507 = vmatmul.msk.bf16.gmra.mxu3 %vm235_vm0, %v200_v48 }
  0x49   :  { %1462 = vmatmul.msk.bf16.gmra.mxu0 %vm235_vm0, %v155_v31  ;;  %1486 = vmatmul.msk.bf16.gmra.mxu1 %vm235_vm0, %v179_v43  ;;  %v130_v31 = vld [vmem:[%s2644_s0 + $0x358] sm:$0xff]  ;;  %v45_v43 = vld [vmem:[%s2644_s0 + $0xb0] sm:$0xff] }
  0x4a   :  { %v204_v32 = vpack.c.bf16 %v130_v31, %v129_v30  ;;  %v137_v30 = vld [vmem:[%s2644_s0 + $0x390] sm:$0xff]  ;;  %v138_v31 = vld [vmem:[%s2644_s0 + $0x398] sm:$0xff] }
  0x4b   :  { %1508 = vmatmul.msk.bf16.gmra.mxu3 %vm235_vm0, %v201_v57 }
  0x59   :  { %1463 = vmatmul.msk.bf16.gmra.mxu0 %vm235_vm0, %v156_v40  ;;  %1487 = vmatmul.msk.bf16.gmra.mxu1 %vm235_vm0, %v180_v52 }
  0x5b   :  { %1509 = vmatmul.msk.bf16.gmra.mxu3 %vm235_vm0, %v202_v2 }
  0x69   :  { %1464 = vmatmul.msk.bf16.gmra.mxu0 %vm235_vm0, %v157_v49  ;;  %1488 = vmatmul.msk.bf16.gmra.mxu1 %vm235_vm0, %v181_v61  ;;  %v162_v49 = vpack.c.bf16 %v46_v44, %v45_v43  ;;  %v48_v61 = vld [vmem:[%s2644_s0 + $0xc8] sm:$0xff]  ;;  %v97_v43 = vld [vmem:[%s2644_s0 + $0x250] sm:$0xff]  ;;  %v98_v44 = vld [vmem:[%s2644_s0 + $0x258] sm:$0xff] }
  0x6a   :  { %v163_v2 = vpack.c.bf16 %v48_v61, %v47_v60  ;;  %v188_v45 = vpack.c.bf16 %v98_v44, %v97_v43  ;;  %v89_v61 = vld [vmem:[%s2644_s0 + $0x210] sm:$0xff] }
  0x6b   :  { %1510 = vmatmul.msk.bf16.gmra.mxu3 %vm235_vm0, %v203_v18 }
  0x6c   :  { %1495 = vmatmul.msk.bf16.vlgmr.msra.gmra.mxu2 %vm235_vm0, %v188_v45 }
  0x79   :  { %1465 = vmatmul.msk.bf16.gmra.mxu0 %vm235_vm0, %v158_v58  ;;  %1489 = vmatmul.msk.bf16.gmra.mxu1 %vm235_vm0, %v182_v11 }
  0x7b   :  { %1511 = vmatmul.msk.bf16.gmra.mxu3 %vm235_vm0, %v204_v32  ;;  %v208_v32 = vpack.c.bf16 %v138_v31, %v137_v30 }
  0x86   :  { %v437_v4 = vpop.f32.mrf.mxu0  ;;  %v1830_v25 = vpop.f32.mrf.mxu1 }
  0x87   :  { %v438_v6 = vadd.f32 %v1800_v5, %v437_v4 }
  0x89   :  { %1466 = vmatmul.msk.bf16.gmra.mxu0 %vm235_vm0, %v159_v3  ;;  %v757_v12 = vmax.f32 %v438_v6, 0.0 }
  0x8b   :  { %1512 = vmatmul.msk.bf16.gmra.mxu3 %vm235_vm0, %v205_v47 }
  0x8e   :  { %v439_v7 = vpop.f32.mrf.mxu0  ;;  %v1847_v36 = vpop.f32.mrf.mxu1 }
  0x8f   :  { %v440_v8 = vadd.f32 %v1800_v5, %v439_v7  ;;  %v1871_v52 = vpop.f32.mrf.mxu3 }
  0x91   :  { %v758_v13 = vmax.f32 %v440_v8, 0.0 }
  0x93   :  { %v1824_v19 = vpack.c.bf16 %v758_v13, %v757_v12  ;;  %v49_v13 = vld [vmem:[%s2644_s0 + $0xd0] sm:$0xff] }
  0x96   :  { %v442_v21 = vpop.f32.mrf.mxu0  ;;  %v1852_v40 = vpop.f32.mrf.mxu1 }
  0x97   :  { %v443_v22 = vadd.f32 %v1800_v5, %v442_v21  ;;  %v1878_v57 = vpop.f32.mrf.mxu3  ;;  %v164_v21 = vpack.c.bf16 %v50_v14, %v49_v13  ;;  %v668_v13 = vadd.f32 %v1800_v5, %v1871_v52  ;;  %v141_v52 = vld [vmem:[%s2644_s0 + $0x3b0] sm:$0xff] }
  0x98   :  { %v670_v14 = vadd.f32 %v1800_v5, %v1878_v57  ;;  %v142_v57 = vld [vmem:[%s2644_s0 + $0x3b8] sm:$0xff] }
  0x99   :  { %1467 = vmatmul.msk.bf16.gmra.mxu0 %vm235_vm0, %v160_v20  ;;  %v759_v26 = vmax.f32 %v443_v22, 0.0  ;;  %v207_v20 = vpack.c.bf16 %v136_v16, %v135_v15  ;;  %v849_v30 = vmax.f32 %v668_v13, 0.0 }
  0x9a   :  { %v850_v31 = vmax.f32 %v670_v14, 0.0 }
  0x9b   :  { %1513 = vmatmul.msk.bf16.gmra.mxu3 %vm235_vm0, %v206_v1  ;;  %v184_v1 = vpack.c.bf16 %v90_v62, %v89_v61  ;;  %v102_v61 = vld [vmem:[%s2644_s0 + $0x278] sm:$0xff] }
  0x9e   :  { %v444_v23 = vpop.f32.mrf.mxu0  ;;  %v1869_v51 = vpop.f32.mrf.mxu1 }
  0x9f   :  { %v445_v24 = vadd.f32 %v1800_v5, %v444_v23  ;;  %v1895_v4 = vpop.f32.mrf.mxu3 }
  0xa0   :  { %v673_v13 = vadd.f32 %v1800_v5, %v1895_v4  ;;  %v143_v4 = vld [vmem:[%s2644_s0 + $0x3c0] sm:$0xff] }
  0xa1   :  { %v760_v27 = vmax.f32 %v445_v24, 0.0 }
  0xa3   :  { %v1844_v33 = vpack.c.bf16 %v760_v27, %v759_v26 }
  0xa6   :  { %v447_v35 = vpop.f32.mrf.mxu0  ;;  %v1876_v56 = vpop.f32.mrf.mxu1 }
  0xa7   :  { %v448_v37 = vadd.f32 %v1800_v5, %v447_v35  ;;  %v1902_v10 = vpop.f32.mrf.mxu3 }
  0xa9   :  { %1468 = vmatmul.msk.bf16.gmra.mxu0 %vm235_vm0, %v161_v34  ;;  %v761_v41 = vmax.f32 %v448_v37, 0.0  ;;  %v165_v34 = vpack.c.bf16 %v52_v29, %v51_v28  ;;  %v55_v28 = vld [vmem:[%s2644_s0 + $0x100] sm:$0xff]  ;;  %v56_v29 = vld [vmem:[%s2644_s0 + $0x108] sm:$0xff] }
  0xaa   :  { %v167_v44 = vpack.c.bf16 %v56_v29, %v55_v28  ;;  %v57_v28 = vld [vmem:[%s2644_s0 + $0x110] sm:$0xff]  ;;  %v58_v29 = vld [vmem:[%s2644_s0 + $0x118] sm:$0xff] }
  0xab   :  { %1514 = vmatmul.msk.bf16.gmra.mxu3 %vm235_vm0, %v207_v20 }
  0xae   :  { %v449_v38 = vpop.f32.mrf.mxu0  ;;  %v1898_v6 = vpop.f32.mrf.mxu1 }
  0xaf   :  { %v450_v39 = vadd.f32 %v1800_v5, %v449_v38  ;;  %v1923_v23 = vpop.f32.mrf.mxu3  ;;  %v87_v38 = vld [vmem:[%s2644_s0 + $0x200] sm:$0xff] }
  0xb1   :  { %v762_v42 = vmax.f32 %v450_v39, 0.0  ;;  %v88_v39 = vld [vmem:[%s2644_s0 + $0x208] sm:$0xff] }
  0xb3   :  { %v1866_v48 = vpack.c.bf16 %v762_v42, %v761_v41  ;;  %v183_v42 = vpack.c.bf16 %v88_v39, %v87_v38  ;;  %v210_v38 = vpack.c.bf16 %v142_v57, %v141_v52  ;;  %v2022_v39 = vpack.c.bf16 %v850_v31, %v849_v30 }
  0xb4   :  { %v851_v30 = vmax.f32 %v673_v13, 0.0 }
  0xb5   :  { %1490 = vmatmul.msk.bf16.gmra.mxu1 %vm235_vm0, %v183_v42 }
  0xb6   :  { %v452_v50 = vpop.f32.mrf.mxu0  ;;  %v1918_v18 = vpop.f32.mrf.mxu1 }
  0xb7   :  { %v453_v53 = vadd.f32 %v1800_v5, %v452_v50  ;;  %v1930_v27 = vpop.f32.mrf.mxu3 }
  0xb9   :  { %1469 = vmatmul.msk.bf16.gmra.mxu0 %vm235_vm0, %v162_v49  ;;  %v763_v58 = vmax.f32 %v453_v53, 0.0  ;;  %v53_v49 = vld [vmem:[%s2644_s0 + $0xf0] sm:$0xff]  ;;  %v54_v53 = vld [vmem:[%s2644_s0 + $0xf8] sm:$0xff] }
  0xbb   :  { %1515 = vmatmul.msk.bf16.gmra.mxu3 %vm235_vm0, %v208_v32 }
  0xbe   :  { %v454_v54 = vpop.f32.mrf.mxu0  ;;  %v1926_v24 = vpop.f32.mrf.mxu1 }
  0xbf   :  { %v455_v55 = vadd.f32 %v1800_v5, %v454_v54  ;;  %v1953_v41 = vpop.f32.mrf.mxu3  ;;  %v139_v54 = vld [vmem:[%s2644_s0 + $0x3a0] sm:$0xff] }
  0xc1   :  { %v764_v59 = vmax.f32 %v455_v55, 0.0  ;;  %v140_v55 = vld [vmem:[%s2644_s0 + $0x3a8] sm:$0xff] }
  0xc3   :  { %v1892_v0 = vpack.c.bf16 %v764_v59, %v763_v58  ;;  %v209_v58 = vpack.c.bf16 %v140_v55, %v139_v54  ;;  %v166_v59 = vpack.c.bf16 %v54_v53, %v53_v49  ;;  %v91_v53 = vld [vmem:[%s2644_s0 + $0x220] sm:$0xff] }
  0xc5   :  { %1491 = vmatmul.msk.bf16.gmra.mxu1 %vm235_vm0, %v184_v1 }
  0xc6   :  { %v457_v3 = vpop.f32.mrf.mxu0  ;;  %v1945_v37 = vpop.f32.mrf.mxu1 }
  0xc7   :  { %v458_v7 = vadd.f32 %v1800_v5, %v457_v3  ;;  %v1964_v47 = vpop.f32.mrf.mxu3  ;;  %v100_v3 = vld [vmem:[%s2644_s0 + $0x268] sm:$0xff] }
  0xc9   :  { %1470 = vmatmul.msk.bf16.gmra.mxu0 %vm235_vm0, %v163_v2  ;;  %v765_v11 = vmax.f32 %v458_v7, 0.0  ;;  %v99_v2 = vld [vmem:[%s2644_s0 + $0x260] sm:$0xff] }
  0xca   :  { %v189_v7 = vpack.c.bf16 %v100_v3, %v99_v2 }
  0xcb   :  { %1516 = vmatmul.msk.bf16.gmra.mxu3 %vm235_vm0, %v209_v58 }
  0xcc   :  { %1496 = vmatmul.msk.bf16.gmra.mxu2 %vm235_vm0, %v189_v7 }
  0xce   :  { %v459_v8 = vpop.f32.mrf.mxu0  ;;  %v1969_v50 = vpop.f32.mrf.mxu1 }
  0xcf   :  { %v460_v9 = vadd.f32 %v1800_v5, %v459_v8  ;;  %v1987_v63 = vpop.f32.mrf.mxu3 }
  0xd1   :  { %v766_v12 = vmax.f32 %v460_v9, 0.0 }
  0xd3   :  { %v1916_v17 = vpack.c.bf16 %v766_v12, %v765_v11 }
  0xd6   :  { %v1921_v22 = vpop.f32.mrf.mxu0  ;;  %v1997_v8 = vpop.f32.mrf.mxu1 }
  0xd7   :  { %v2006_v15 = vpop.f32.mrf.mxu3  ;;  %v463_v1 = vadd.f32 %v1800_v5, %v1921_v22  ;;  %v675_v22 = vadd.f32 %v1800_v5, %v1902_v10  ;;  %v144_v10 = vld [vmem:[%s2644_s0 + $0x3c8] sm:$0xff] }
  0xd8   :  { %v211_v52 = vpack.c.bf16 %v144_v10, %v143_v4  ;;  %v962_v4 = vsel %vm235_vm0, %v1866_v48, 0  ;;  %v61_v48 = vld [vmem:[%s2644_s0 + $0x130] sm:$0xff] }
  0xd9   :  { %1471 = vmatmul.msk.bf16.gmra.mxu0 %vm235_vm0, %v164_v21  ;;  %v852_v31 = vmax.f32 %v675_v22, 0.0 }
  0xdb   :  { %1517 = vmatmul.msk.bf16.gmra.mxu3 %vm235_vm0, %v210_v38  ;;  %v168_v38 = vpack.c.bf16 %v58_v29, %v57_v28  ;;  %v95_v28 = vld [vmem:[%s2644_s0 + $0x240] sm:$0xff]  ;;  %v96_v29 = vld [vmem:[%s2644_s0 + $0x248] sm:$0xff] }
  0xde   :  { %v1928_v26 = vpop.f32.mrf.mxu0  ;;  %v2025_v45 = vpop.f32.mrf.mxu1 }
  0xdf   :  { %v2034_v54 = vpop.f32.mrf.mxu3  ;;  %v465_v58 = vadd.f32 %v1800_v5, %v1928_v26 }
  0xe1   :  { %v768_v26 = vmax.f32 %v465_v58, 0.0 }
  0xe6   :  { %v467_v35 = vpop.f32.mrf.mxu0 }
  0xe7   :  { %v468_v32 = vadd.f32 %v1800_v5, %v467_v35  ;;  %v92_v35 = vld [vmem:[%s2644_s0 + $0x228] sm:$0xff]  ;;  %v2058_v14 = vpop.f32.mrf.mxu3 }
  0xe8   :  { %v185_v55 = vpack.c.bf16 %v92_v35, %v91_v53 }
  0xe9   :  { %1472 = vmatmul.msk.bf16.gmra.mxu0 %vm235_vm0, %v165_v34  ;;  %v769_v49 = vmax.f32 %v468_v32, 0.0  ;;  %v2074_v32 = vpack.c.bf16 %v852_v31, %v851_v30  ;;  %v187_v31 = vpack.c.bf16 %v96_v29, %v95_v28  ;;  %v956_v29 = vsel %vm235_vm0, %v1824_v19, 0 }
  0xea   :  { %1492 = vmatmul.msk.bf16.gmra.mxu1 %vm235_vm0, %v185_v55  ;;  %v968_v55 = vsel %vm235_vm0, %v1916_v17, 0  ;;  %v60_v17 = vld [vmem:[%s2644_s0 + $0x128] sm:$0xff] }
  0xeb   :  { %1518 = vmatmul.msk.bf16.gmra.mxu3 %vm235_vm0, %v211_v52 }
  0xee   :  { %v469_v46 = vpop.f32.mrf.mxu0 }
  0xef   :  { %v470_v16 = vadd.f32 %v1800_v5, %v469_v46 }
  0xf1   :  { %v770_v42 = vmax.f32 %v470_v16, 0.0 }
  0xf6   :  { %v472_v60 = vpop.f32.mrf.mxu0 }
  0xf7   :  { %v473_v9 = vadd.f32 %v1800_v5, %v472_v60  ;;  %v101_v60 = vld [vmem:[%s2644_s0 + $0x270] sm:$0xff] }
  0xf8   :  { %v190_v62 = vpack.c.bf16 %v102_v61, %v101_v60  ;;  %v678_v60 = vadd.f32 %v1800_v5, %v1923_v23  ;;  %v680_v61 = vadd.f32 %v1800_v5, %v1930_v27  ;;  %v145_v23 = vld [vmem:[%s2644_s0 + $0x3d0] sm:$0xff]  ;;  %v146_v27 = vld [vmem:[%s2644_s0 + $0x3d8] sm:$0xff] }
  0xf9   :  { %1473 = vmatmul.msk.bf16.gmra.mxu0 %vm235_vm0, %v166_v59  ;;  %v771_v20 = vmax.f32 %v473_v9, 0.0  ;;  %v892_v59 = vpack.c.bf16 %v770_v42, %v769_v49  ;;  %v767_v9 = vmax.f32 %v463_v1, 0.0 }
  0xfa   :  { %1497 = vmatmul.msk.bf16.gmra.mxu2 %vm235_vm0, %v190_v62 }
  0xfb   :  { %v974_v3 = vsel %vm235_vm0, %v892_v59, 0 }
  0xfe   :  { %v474_v11 = vpop.f32.mrf.mxu0 }
  0xff   :  { %v475_v12 = vadd.f32 %v1800_v5, %v474_v11 }
 0x101   :  { %v772_v21 = vmax.f32 %v475_v12, 0.0  ;;  %v2052_v12 = vpop.f32.mrf.mxu1 }
 0x103   :  { %v893_v34 = vpack.c.bf16 %v772_v21, %v771_v20  ;;  %v891_v21 = vpack.c.bf16 %v768_v26, %v767_v9 }
 0x105   :  { %v977_v43 = vsel %vm235_vm0, %v893_v34, 0  ;;  %v971_v34 = vsel %vm235_vm0, %v891_v21, 0 }
 0x106   :  { %v477_v46 = vpop.f32.mrf.mxu0  ;;  %1147 = vmatpush.bf16.xpose.msrb.mxu1 %v977_v43  ;;  %v93_v43 = vld [vmem:[%s2644_s0 + $0x230] sm:$0xff] }
 0x107   :  { %v478_v2 = vadd.f32 %v1800_v5, %v477_v46  ;;  %v2084_v46 = vpop.f32.mrf.mxu3 }
 0x109   :  { %1474 = vmatmul.msk.bf16.gmra.mxu0 %vm235_vm0, %v167_v44  ;;  %v773_v16 = vmax.f32 %v478_v2, 0.0  ;;  %v94_v44 = vld [vmem:[%s2644_s0 + $0x238] sm:$0xff]  ;;  %v2087_v53 = vpop.f32.mrf.mxu1  ;;  %v59_v2 = vld [vmem:[%s2644_s0 + $0x120] sm:$0xff] }
 0x10a   :  { %v186_v49 = vpack.c.bf16 %v94_v44, %v93_v43 }
 0x10c   :  { %1493 = vmatmul.msk.bf16.gmra.mxu1 %vm235_vm0, %v186_v49 }
 0x10e   :  { %v479_v7 = vpop.f32.mrf.mxu0  ;;  %1148 = vmatpush.bf16.xpose.msrb.mxu1 %v974_v3  ;;  %v853_v3 = vmax.f32 %v678_v60, 0.0  ;;  %v148_v60 = vld [vmem:[%s2644_s0 + $0x3e8] sm:$0xff] }
 0x10f   :  { %v480_v11 = vadd.f32 %v1800_v5, %v479_v7  ;;  %v2098_v62 = vpop.f32.mrf.mxu3  ;;  %v854_v7 = vmax.f32 %v680_v61, 0.0 }
 0x111   :  { %v774_v20 = vmax.f32 %v480_v11, 0.0  ;;  %v592_v9 = vpop.f32.mrf.mxu1  ;;  %v212_v11 = vpack.c.bf16 %v146_v27, %v145_v23  ;;  %v2114_v22 = vpack.c.bf16 %v854_v7, %v853_v3  ;;  %v959_v3 = vsel %vm235_vm0, %v1844_v33, 0 }
 0x112   :  { %v593_v43 = vadd.f32 %v1800_v5, %v592_v9  ;;  %v588_v27 = vadd.f32 %v1800_v5, %v2052_v12  ;;  %v590_v9 = vadd.f32 %v1800_v5, %v2087_v53  ;;  %v583_v53 = vadd.f32 %v1800_v5, %v1997_v8  ;;  %v103_v8 = vld [vmem:[%s2644_s0 + $0x280] sm:$0xff] }
 0x113   :  { %v2072_v57 = vpack.c.bf16 %v774_v20, %v773_v16  ;;  %v965_v16 = vsel %vm235_vm0, %v1892_v0, 0  ;;  %v169_v20 = vpack.c.bf16 %v60_v17, %v59_v2  ;;  %1519 = vmatmul.msk.bf16.gmra.mxu3 %vm235_vm0, %v212_v11 }
 0x116   :  { %v482_v42 = vpop.f32.mrf.mxu0  ;;  %1149 = vmatpush.bf16.xpose.msrb.mxu1 %v971_v34 }
 0x117   :  { %v483_v35 = vadd.f32 %v1800_v5, %v482_v42  ;;  %v2125_v30 = vpop.f32.mrf.mxu3  ;;  %v685_v42 = vadd.f32 %v1800_v5, %v1964_v47  ;;  %v147_v47 = vld [vmem:[%s2644_s0 + $0x3e0] sm:$0xff] }
 0x118   :  { %v213_v61 = vpack.c.bf16 %v148_v60, %v147_v47 }
 0x119   :  { %1475 = vmatmul.msk.bf16.gmra.mxu0 %vm235_vm0, %v168_v38  ;;  %v775_v1 = vmax.f32 %v483_v35, 0.0  ;;  %v594_v10 = vpop.f32.mrf.mxu1  ;;  %v683_v38 = vadd.f32 %v1800_v5, %v1953_v41 }
 0x11a   :  { %v595_v44 = vadd.f32 %v1800_v5, %v594_v10  ;;  %v688_v10 = vadd.f32 %v1800_v5, %v1987_v63  ;;  %v64_v63 = vld [vmem:[%s2644_s0 + $0x148] sm:$0xff] }
 0x11b   :  { %v855_v41 = vmax.f32 %v683_v38, 0.0 }
 0x11c   :  { %1494 = vmatmul.msk.bf16.gmra.mxu1 %vm235_vm0, %v187_v31  ;;  %v820_v2 = vmax.f32 %v595_v44, 0.0 }
 0x11e   :  { %v484_v58 = vpop.f32.mrf.mxu0  ;;  %1150 = vmatpush.bf16.xpose.msrb.mxu1 %v968_v55 }
 0x11f   :  { %v485_v59 = vadd.f32 %v1800_v5, %v484_v58  ;;  %v2139_v49 = vpop.f32.mrf.mxu3  ;;  %v62_v58 = vld [vmem:[%s2644_s0 + $0x138] sm:$0xff] }
 0x120   :  { %v170_v7 = vpack.c.bf16 %v62_v58, %v61_v48 }
 0x121   :  { %v776_v26 = vmax.f32 %v485_v59, 0.0  ;;  %v856_v59 = vmax.f32 %v685_v42, 0.0  ;;  %v63_v42 = vld [vmem:[%s2644_s0 + $0x140] sm:$0xff] }
 0x123   :  { %v2112_v13 = vpack.c.bf16 %v776_v26, %v775_v1  ;;  %v819_v26 = vmax.f32 %v593_v43, 0.0  ;;  %v2155_v17 = vpack.c.bf16 %v856_v59, %v855_v41  ;;  %1520 = vmatmul.msk.bf16.gmra.mxu3 %vm235_vm0, %v213_v61  ;;  %v815_v41 = vmax.f32 %v583_v53, 0.0 }
 0x124   :  { %v171_v61 = vpack.c.bf16 %v64_v63, %v63_v42 }
 0x125   :  { %v917_v11 = vpack.c.bf16 %v820_v2, %v819_v26  ;;  %v578_v2 = vadd.f32 %v1800_v5, %v1945_v37 }
 0x126   :  { %v487_v21 = vpop.f32.mrf.mxu0  ;;  %1151 = vmatpush.bf16.xpose.msrb.mxu1 %v965_v16 }
 0x127   :  { %v488_v0 = vadd.f32 %v1800_v5, %v487_v21  ;;  %v2164_v16 = vpop.f32.mrf.mxu3  ;;  %v818_v21 = vmax.f32 %v590_v9, 0.0  ;;  %v1049_v33 = vsel %vm235_vm0, %v917_v11, 0 }
 0x129   :  { %1476 = vmatmul.msk.bf16.gmra.mxu0 %vm235_vm0, %v169_v20  ;;  %v777_v35 = vmax.f32 %v488_v0, 0.0  ;;  %v817_v20 = vmax.f32 %v588_v27, 0.0  ;;  %v813_v27 = vmax.f32 %v578_v2, 0.0  ;;  %v108_v2 = vld [vmem:[%s2644_s0 + $0x2a8] sm:$0xff] }
 0x12b   :  { %v916_v0 = vpack.c.bf16 %v818_v21, %v817_v20 }
 0x12d   :  { %v1046_v47 = vsel %vm235_vm0, %v916_v0, 0 }
 0x12e   :  { %v489_v52 = vpop.f32.mrf.mxu0  ;;  %1152 = vmatpush.bf16.xpose.msrb.mxu1 %v962_v4  ;;  %v585_v4 = vadd.f32 %v1800_v5, %v2025_v45  ;;  %v104_v45 = vld [vmem:[%s2644_s0 + $0x288] sm:$0xff] }
 0x12f   :  { %v490_v34 = vadd.f32 %v1800_v5, %v489_v52  ;;  %v690_v52 = vadd.f32 %v1800_v5, %v2006_v15  ;;  %v857_v15 = vmax.f32 %v688_v10, 0.0  ;;  %v191_v44 = vpack.c.bf16 %v104_v45, %v103_v8 }
 0x130   :  { %v816_v59 = vmax.f32 %v585_v4, 0.0  ;;  %v106_v4 = vld [vmem:[%s2644_s0 + $0x298] sm:$0xff] }
 0x131   :  { %v778_v55 = vmax.f32 %v490_v34, 0.0  ;;  %v2180_v34 = vpop.f32.mrf.mxu3  ;;  %v858_v43 = vmax.f32 %v690_v52, 0.0  ;;  %1498 = vmatmul.msk.bf16.gmra.mxu2 %vm235_vm0, %v191_v44  ;;  %v568_v44 = vadd.f32 %v1800_v5, %v1876_v56 }
 0x133   :  { %v2153_v1 = vpack.c.bf16 %v778_v55, %v777_v35  ;;  %v149_v35 = vld [vmem:[%s2644_s0 + $0x3f0] sm:$0xff]  ;;  %v150_v55 = vld [vmem:[%s2644_s0 + $0x3f8] sm:$0xff]  ;;  %v2204_v60 = vpack.c.bf16 %v858_v43, %v857_v15  ;;  %v2248_v43 = vld [vmem:[%s2647_s3] sm:$0x1] }
 0x134   :  { %v214_v58 = vpack.c.bf16 %v150_v55, %v149_v35  ;;  %v570_v35 = vadd.f32 %v1800_v5, %v1898_v6  ;;  %v107_v6 = vld [vmem:[%s2644_s0 + $0x2a0] sm:$0xff] }
 0x136   :  { %v492_v23 = vpop.f32.mrf.mxu0  ;;  %1153 = vmatpush.bf16.xpose.msrb.mxu1 %v959_v3  ;;  %1521 = vmatmul.msk.bf16.gmra.mxu3 %vm235_vm0, %v214_v58  ;;  %v580_v3 = vadd.f32 %v1800_v5, %v1969_v50  ;;  %v575_v50 = vadd.f32 %v1800_v5, %v1926_v24  ;;  %v65_v24 = vld [vmem:[%s2644_s0 + $0x150] sm:$0xff] }
 0x137   :  { %v493_v28 = vadd.f32 %v1800_v5, %v492_v23 }
 0x138   :  { %v814_v9 = vmax.f32 %v580_v3, 0.0  ;;  %v812_v42 = vmax.f32 %v575_v50, 0.0  ;;  %v563_v3 = vadd.f32 %v1800_v5, %v1852_v40 }
 0x139   :  { %1477 = vmatmul.msk.bf16.gmra.mxu0 %vm235_vm0, %v170_v7  ;;  %v779_v19 = vmax.f32 %v493_v28, 0.0  ;;  %v915_v7 = vpack.c.bf16 %v816_v59, %v815_v41  ;;  %v2211_v23 = vpop.f32.mrf.mxu3  ;;  %v809_v41 = vmax.f32 %v568_v44, 0.0  ;;  %v810_v59 = vmax.f32 %v570_v35, 0.0 }
 0x13a   :  { %v914_v28 = vpack.c.bf16 %v814_v9, %v813_v27  ;;  %v67_v27 = vld [vmem:[%s2644_s0 + $0x160] sm:$0xff]  ;;  %v68_v9 = vld [vmem:[%s2644_s0 + $0x168] sm:$0xff] }
 0x13b   :  { %v1043_v11 = vsel %vm235_vm0, %v915_v7, 0  ;;  %v565_v7 = vadd.f32 %v1800_v5, %v1869_v51  ;;  %v713_v51 = vadd.f32 %v1800_v5, %v2211_v23 }
 0x13c   :  { %v1040_v8 = vsel %vm235_vm0, %v914_v28, 0 }
 0x13e   :  { %v494_v31 = vpop.f32.mrf.mxu0  ;;  %1154 = vmatpush.bf16.xpose.msrb.mxu1 %v956_v29  ;;  %v693_v29 = vadd.f32 %v1800_v5, %v2034_v54  ;;  %v66_v54 = vld [vmem:[%s2644_s0 + $0x158] sm:$0xff] }
 0x13f   :  { %v495_v12 = vadd.f32 %v1800_v5, %v494_v31  ;;  %v695_v31 = vadd.f32 %v1800_v5, %v2058_v14  ;;  %v172_v63 = vpack.c.bf16 %v66_v54, %v65_v24 }
 0x140   :  { %v859_v14 = vmax.f32 %v693_v29, 0.0  ;;  %v558_v29 = vadd.f32 %v1800_v5, %v1830_v25  ;;  %v710_v25 = vadd.f32 %v1800_v5, %v2180_v34 }
 0x141   :  { %v780_v38 = vmax.f32 %v495_v12, 0.0  ;;  %v714_v12 = vpop.f32.mrf.mxu3  ;;  %v860_v10 = vmax.f32 %v695_v31, 0.0  ;;  %v560_v31 = vadd.f32 %v1800_v5, %v1847_v36 }
 0x142   :  { %v715_v28 = vadd.f32 %v1800_v5, %v714_v12  ;;  %v805_v24 = vmax.f32 %v558_v29, 0.0  ;;  %v708_v12 = vadd.f32 %v1800_v5, %v2164_v16  ;;  %v70_v16 = vld [vmem:[%s2644_s0 + $0x178] sm:$0xff]  ;;  %v111_v29 = vld [vmem:[%s2644_s0 + $0x2c0] sm:$0xff] }
 0x143   :  { %v2200_v48 = vpack.c.bf16 %v780_v38, %v779_v19  ;;  %v2241_v45 = vpack.c.bf16 %v860_v10, %v859_v14  ;;  %v806_v54 = vmax.f32 %v560_v31, 0.0  ;;  %v112_v31 = vld [vmem:[%s2644_s0 + $0x2c8] sm:$0xff] }
 0x144   :  { %v865_v35 = vmax.f32 %v708_v12, 0.0 }
 0x145   :  { %1522 = vmatmul.msk.bf16.vlgmr.msrb.gmra.mxu1 %vm235_vm0, %v2248_v43 }
 0x146   :  { %1186 = vmatpush.bf16.xpose.msra.mxu1 %v1049_v33  ;;  %v497_v26 = vpop.f32.mrf.mxu0  ;;  %v573_v33 = vadd.f32 %v1800_v5, %v1918_v18  ;;  %v105_v18 = vld [vmem:[%s2644_s0 + $0x290] sm:$0xff] }
 0x147   :  { %v498_v20 = vadd.f32 %v1800_v5, %v497_v26  ;;  %v192_v52 = vpack.c.bf16 %v106_v4, %v105_v18  ;;  %v912_v26 = vpack.c.bf16 %v810_v59, %v809_v41  ;;  %v867_v18 = vmax.f32 %v713_v51, 0.0 }
 0x148   :  { %v811_v38 = vmax.f32 %v573_v33, 0.0  ;;  %v807_v33 = vmax.f32 %v563_v3, 0.0  ;;  %v868_v4 = vmax.f32 %v715_v28, 0.0 }
 0x149   :  { %1478 = vmatmul.msk.bf16.gmra.mxu0 %vm235_vm0, %v171_v61  ;;  %v781_v0 = vmax.f32 %v498_v20, 0.0  ;;  %1499 = vmatmul.msk.bf16.gmra.mxu2 %vm235_vm0, %v192_v52  ;;  %v2254_v58 = vpop.f32.mrf.mxu3  ;;  %v1034_v20 = vsel %vm235_vm0, %v912_v26, 0  ;;  %v109_v52 = vld [vmem:[%s2644_s0 + $0x2b0] sm:$0xff] }
 0x14a   :  { %v913_v55 = vpack.c.bf16 %v812_v42, %v811_v38  ;;  %v941_v36 = vpack.c.bf16 %v868_v4, %v867_v18  ;;  %v110_v38 = vld [vmem:[%s2644_s0 + $0x2b8] sm:$0xff]  ;;  %v69_v42 = vld [vmem:[%s2644_s0 + $0x170] sm:$0xff] }
 0x14b   :  { %v174_v44 = vpack.c.bf16 %v70_v16, %v69_v42 }
 0x14c   :  { %v1121_v41 = vsel %vm235_vm0, %v941_v36, 0 }
 0x14e   :  { %1187 = vmatpush.bf16.xpose.msra.mxu1 %v1046_v47  ;;  %v499_v21 = vpop.f32.mrf.mxu0  ;;  %v1037_v47 = vsel %vm235_vm0, %v913_v55, 0  ;;  %v866_v55 = vmax.f32 %v710_v25, 0.0 }
 0x14f   :  { %v500_v37 = vadd.f32 %v1800_v5, %v499_v21  ;;  %v173_v21 = vpack.c.bf16 %v68_v9, %v67_v27 }
 0x150   :  { %v940_v3 = vpack.c.bf16 %v866_v55, %v865_v35 }
 0x151   :  { %v782_v53 = vmax.f32 %v500_v37, 0.0  ;;  %v2262_v56 = vpop.f32.mrf.mxu3  ;;  %v808_v37 = vmax.f32 %v565_v7, 0.0  ;;  %v2325_v7 = vpop.f32.mrf.mxu2 }
 0x153   :  { %v2237_v19 = vpack.c.bf16 %v782_v53, %v781_v0  ;;  %v911_v0 = vpack.c.bf16 %v808_v37, %v807_v33  ;;  %v2292_v53 = vpop.f32.mrf.mxu1 }
 0x155   :  { %v1031_v10 = vsel %vm235_vm0, %v911_v0, 0  ;;  %v195_v0 = vpack.c.bf16 %v112_v31, %v111_v29 }
 0x156   :  { %1188 = vmatpush.bf16.xpose.msra.mxu1 %v1043_v11  ;;  %v2243_v15 = vpop.f32.mrf.mxu0  ;;  %v193_v11 = vpack.c.bf16 %v108_v2, %v107_v6  ;;  %v703_v6 = vadd.f32 %v1800_v5, %v2125_v30  ;;  %v705_v2 = vadd.f32 %v1800_v5, %v2139_v49 }
 0x158   :  { %v863_v9 = vmax.f32 %v703_v6, 0.0 }
 0x159   :  { %1479 = vmatmul.msk.bf16.gmra.mxu0 %vm235_vm0, %v172_v63  ;;  %1500 = vmatmul.msk.bf16.gmra.mxu2 %vm235_vm0, %v193_v11  ;;  %v2282_v50 = vpop.f32.mrf.mxu3  ;;  %v194_v63 = vpack.c.bf16 %v110_v38, %v109_v52  ;;  %v864_v11 = vmax.f32 %v705_v2, 0.0  ;;  %v2351_v36 = vpop.f32.mrf.mxu2 }
 0x15b   :  { %v2314_v34 = vpop.f32.mrf.mxu1  ;;  %v939_v28 = vpack.c.bf16 %v864_v11, %v863_v9  ;;  %v113_v9 = vld [vmem:[%s2644_s0 + $0x2d0] sm:$0xff]  ;;  %v114_v11 = vld [vmem:[%s2644_s0 + $0x2d8] sm:$0xff] }
 0x15d   :  { %v1115_v25 = vsel %vm235_vm0, %v939_v28, 0  ;;  %v1109_v28 = vsel %vm235_vm0, %v2241_v45, 0  ;;  %v720_v45 = vadd.f32 %v1800_v5, %v2262_v56  ;;  %v1103_v56 = vsel %vm235_vm0, %v2155_v17, 0 }
 0x15e   :  { %1189 = vmatpush.bf16.xpose.msra.mxu1 %v1040_v8  ;;  %v2260_v61 = vpop.f32.mrf.mxu0  ;;  %v910_v8 = vpack.c.bf16 %v806_v54, %v805_v24  ;;  %v698_v54 = vadd.f32 %v1800_v5, %v2084_v46 }
 0x15f   :  { %v505_v46 = vadd.f32 %v1800_v5, %v2260_v61 }
 0x161   :  { %v2295_v23 = vpop.f32.mrf.mxu3  ;;  %v784_v35 = vmax.f32 %v505_v46, 0.0  ;;  %v2365_v61 = vpop.f32.mrf.mxu2 }
 0x163   :  { %v2329_v33 = vpop.f32.mrf.mxu1 }
 0x166   :  { %1190 = vmatpush.bf16.xpose.msra.mxu1 %v1037_v47  ;;  %v507_v40 = vpop.f32.mrf.mxu0  ;;  %v1028_v47 = vsel %vm235_vm0, %v910_v8, 0  ;;  %v503_v8 = vadd.f32 %v1800_v5, %v2243_v15 }
 0x167   :  { %v508_v4 = vadd.f32 %v1800_v5, %v507_v40  ;;  %v861_v40 = vmax.f32 %v698_v54, 0.0 }
 0x169   :  { %1480 = vmatmul.msk.bf16.gmra.mxu0 %vm235_vm0, %v173_v21  ;;  %1501 = vmatmul.msk.bf16.gmra.mxu2 %vm235_vm0, %v194_v63  ;;  %v2318_v26 = vpop.f32.mrf.mxu3  ;;  %v785_v38 = vmax.f32 %v508_v4, 0.0  ;;  %v629_v29 = vpop.f32.mrf.mxu2  ;;  %v992_v4 = vsel %vm235_vm0, %v2237_v19, 0  ;;  %v870_v19 = vmax.f32 %v720_v45, 0.0 }
 0x16b   :  { %v2353_v16 = vpop.f32.mrf.mxu1 }
 0x16e   :  { %1191 = vmatpush.bf16.xpose.msra.mxu1 %v1034_v20  ;;  %v509_v14 = vpop.f32.mrf.mxu0  ;;  %v1118_v20 = vsel %vm235_vm0, %v940_v3, 0 }
 0x16f   :  { %v510_v49 = vadd.f32 %v1800_v5, %v509_v14  ;;  %v700_v14 = vadd.f32 %v1800_v5, %v2098_v62 }
 0x171   :  { %v2341_v18 = vpop.f32.mrf.mxu3  ;;  %v862_v42 = vmax.f32 %v700_v14, 0.0  ;;  %v1106_v14 = vsel %vm235_vm0, %v2204_v60, 0  ;;  %v989_v60 = vsel %vm235_vm0, %v2200_v48, 0  ;;  %v2415_v48 = vld [vmem:[%s2646_s2] ss:$0 sm:$0xff] }
 0x172   :  { %v598_v17 = vadd.f32 %v2415_v48, %v2292_v53 }
 0x173   :  { %v938_v63 = vpack.c.bf16 %v862_v42, %v861_v40 }
 0x175   :  { %v1112_v2 = vsel %vm235_vm0, %v938_v63, 0 }
 0x176   :  { %1192 = vmatpush.bf16.xpose.msra.mxu1 %v1031_v10  ;;  %v512_v59 = vpop.f32.mrf.mxu0  ;;  %v786_v10 = vmax.f32 %v510_v49, 0.0 }
 0x177   :  { %v513_v27 = vadd.f32 %v1800_v5, %v512_v59 }
 0x178   :  { %v900_v62 = vpack.c.bf16 %v786_v10, %v785_v38  ;;  %v718_v10 = vadd.f32 %v1800_v5, %v2254_v58 }
 0x179   :  { %1481 = vmatmul.msk.bf16.gmra.mxu0 %vm235_vm0, %v174_v44  ;;  %v787_v37 = vmax.f32 %v513_v27, 0.0  ;;  %1502 = vmatmul.msk.bf16.gmra.mxu2 %vm235_vm0, %v195_v0  ;;  %v2359_v44 = vpop.f32.mrf.mxu3 }
 0x17a   :  { %v869_v38 = vmax.f32 %v718_v10, 0.0 }
 0x17c   :  { %v2399_v46 = vpack.c.bf16 %v870_v19, %v869_v38 }
 0x17d   :  { %v632_v40 = vpop.f32.mrf.mxu2 }
 0x17e   :  { %1193 = vmatpush.bf16.xpose.msra.mxu1 %v1028_v47  ;;  %v514_v21 = vpop.f32.mrf.mxu0  ;;  %v783_v47 = vmax.f32 %v503_v8, 0.0 }
 0x17f   :  { %v515_v30 = vadd.f32 %v1800_v5, %v514_v21  ;;  %v2373_v21 = vpop.f32.mrf.mxu1 }
 0x180   :  { %v899_v27 = vpack.c.bf16 %v784_v35, %v783_v47  ;;  %v986_v35 = vsel %vm235_vm0, %v2153_v1, 0  ;;  %v600_v47 = vadd.f32 %v2415_v48, %v2314_v34  ;;  %v723_v1 = vadd.f32 %v2415_v48, %v2282_v50 }
 0x181   :  { %v788_v51 = vmax.f32 %v515_v30, 0.0 }
 0x182   :  { %v995_v49 = vsel %vm235_vm0, %v899_v27, 0  ;;  %v822_v34 = vmax.f32 %v600_v47, 0.0 }
 0x183   :  { %v901_v24 = vpack.c.bf16 %v788_v51, %v787_v37  ;;  %v2379_v51 = vpop.f32.mrf.mxu3 }
 0x185   :  { %1525 = vmatmul.msk.bf16.vlgmr.msra.gmra.mxu1 %vm235_vm0, %v2248_v43  ;;  %v1001_v12 = vsel %vm235_vm0, %v901_v24, 0 }
 0x186   :  { %1225 = vmatpush.bf16.xpose.msrb.mxu1 %v1121_v41  ;;  %v517_v52 = vpop.f32.mrf.mxu0  ;;  %1160 = vmatpush.bf16.xpose.msrb.mxu2 %v1001_v12  ;;  %v998_v41 = vsel %vm235_vm0, %v900_v62, 0 }
 0x187   :  { %v518_v55 = vadd.f32 %v1800_v5, %v517_v52  ;;  %v2383_v31 = vpop.f32.mrf.mxu1 }
 0x189   :  { %v789_v3 = vmax.f32 %v518_v55, 0.0  ;;  %v634_v55 = vpop.f32.mrf.mxu2 }
 0x18b   :  { %v2395_v12 = vpop.f32.mrf.mxu3 }
 0x18e   :  { %1226 = vmatpush.bf16.xpose.msrb.mxu1 %v1118_v20  ;;  %v519_v59 = vpop.f32.mrf.mxu0  ;;  %1161 = vmatpush.bf16.xpose.msrb.mxu2 %v998_v41  ;;  %v196_v20 = vpack.c.bf16 %v114_v11, %v113_v9  ;;  %v821_v9 = vmax.f32 %v598_v17, 0.0  ;;  %v871_v11 = vmax.f32 %v723_v1, 0.0 }
 0x18f   :  { %v520_v6 = vadd.f32 %v1800_v5, %v519_v59  ;;  %v2403_v58 = vpop.f32.mrf.mxu1 }
 0x190   :  { %1503 = vmatmul.msk.bf16.gmra.mxu2 %vm235_vm0, %v196_v20 }
 0x191   :  { %v790_v15 = vmax.f32 %v520_v6, 0.0  ;;  %v725_v6 = vadd.f32 %v2415_v48, %v2295_v23 }
 0x193   :  { %v2375_v30 = vpack.c.bf16 %v790_v15, %v789_v3  ;;  %v2407_v8 = vpop.f32.mrf.mxu3  ;;  %v635_v3 = vadd.f32 %v2415_v48, %v634_v55  ;;  %v872_v20 = vmax.f32 %v725_v6, 0.0 }
 0x195   :  { %v2436_v50 = vpack.c.bf16 %v872_v20, %v871_v11 }
 0x196   :  { %1227 = vmatpush.bf16.xpose.msrb.mxu1 %v1115_v25  ;;  %v522_v37 = vpop.f32.mrf.mxu0  ;;  %1162 = vmatpush.bf16.xpose.msrb.mxu2 %v995_v49 }
 0x197   :  { %v523_v0 = vadd.f32 %v1800_v5, %v522_v37  ;;  %v2430_v15 = vpop.f32.mrf.mxu1  ;;  %v836_v37 = vmax.f32 %v635_v3, 0.0 }
 0x199   :  { %v791_v25 = vmax.f32 %v523_v0, 0.0  ;;  %v983_v0 = vsel %vm235_vm0, %v2112_v13, 0  ;;  %v980_v13 = vsel %vm235_vm0, %v2072_v57, 0 }
 0x19e   :  { %1228 = vmatpush.bf16.xpose.msrb.mxu1 %v1112_v2  ;;  %v524_v24 = vpop.f32.mrf.mxu0  ;;  %1163 = vmatpush.bf16.xpose.msrb.mxu2 %v992_v4  ;;  %v633_v2 = vadd.f32 %v2415_v48, %v632_v40 }
 0x19f   :  { %v525_v54 = vadd.f32 %v1800_v5, %v524_v24  ;;  %v628_v24 = vadd.f32 %v2415_v48, %v2365_v61  ;;  %v617_v10 = vpop.f32.mrf.mxu1  ;;  %v603_v61 = vadd.f32 %v2415_v48, %v2329_v33  ;;  %v625_v33 = vadd.f32 %v2415_v48, %v2351_v36 }
 0x1a0   :  { %v835_v23 = vmax.f32 %v633_v2, 0.0  ;;  %v618_v3 = vadd.f32 %v2415_v48, %v617_v10  ;;  %v733_v10 = vadd.f32 %v2415_v48, %v2359_v44 }
 0x1a1   :  { %v792_v52 = vmax.f32 %v525_v54, 0.0  ;;  %v630_v54 = vadd.f32 %v2415_v48, %v629_v29  ;;  %v833_v45 = vmax.f32 %v628_v24, 0.0  ;;  %v605_v29 = vadd.f32 %v2415_v48, %v2353_v16 }
 0x1a2   :  { %v823_v55 = vmax.f32 %v603_v61, 0.0  ;;  %v615_v24 = vadd.f32 %v2415_v48, %v2430_v15 }
 0x1a3   :  { %v2397_v42 = vpack.c.bf16 %v792_v52, %v791_v25  ;;  %v834_v25 = vmax.f32 %v630_v54, 0.0 }
 0x1a5   :  { %v924_v57 = vpack.c.bf16 %v834_v25, %v833_v45  ;;  %v735_v45 = vadd.f32 %v2415_v48, %v2379_v51 }
 0x1a6   :  { %1229 = vmatpush.bf16.xpose.msrb.mxu1 %v1109_v28  ;;  %v527_v62 = vpop.f32.mrf.mxu0  ;;  %1164 = vmatpush.bf16.xpose.msrb.mxu2 %v989_v60  ;;  %v2438_v28 = vpop.f32.mrf.mxu3 }
 0x1a7   :  { %v528_v63 = vadd.f32 %v1800_v5, %v527_v62  ;;  %v1100_v5 = vsel %vm235_vm0, %v2114_v22, 0  ;;  %v2432_v22 = vpack.c.bf16 %v822_v34, %v821_v9  ;;  %v728_v62 = vadd.f32 %v2415_v48, %v2318_v26  ;;  %v619_v1 = vpop.f32.mrf.mxu1 }
 0x1a8   :  { %v620_v36 = vadd.f32 %v2415_v48, %v619_v1  ;;  %v829_v34 = vmax.f32 %v618_v3, 0.0 }
 0x1a9   :  { %v793_v53 = vmax.f32 %v528_v63, 0.0  ;;  %v873_v17 = vmax.f32 %v728_v62, 0.0 }
 0x1aa   :  { %v830_v11 = vmax.f32 %v620_v36, 0.0 }
 0x1ac   :  { %v922_v54 = vpack.c.bf16 %v830_v11, %v829_v34 }
 0x1ae   :  { %1230 = vmatpush.bf16.xpose.msrb.mxu1 %v1106_v14  ;;  %v529_v41 = vpop.f32.mrf.mxu0  ;;  %1165 = vmatpush.bf16.xpose.msrb.mxu2 %v986_v35  ;;  %v925_v14 = vpack.c.bf16 %v836_v37, %v835_v23  ;;  %v2451_v40 = vpop.f32.mrf.mxu3  ;;  %v1064_v62 = vsel %vm235_vm0, %v922_v54, 0 }
 0x1af   :  { %v530_v59 = vadd.f32 %v2415_v48, %v529_v41  ;;  %v824_v41 = vmax.f32 %v605_v29, 0.0 }
 0x1b0   :  { %v1073_v52 = vsel %vm235_vm0, %v925_v14, 0 }
 0x1b1   :  { %v794_v27 = vmax.f32 %v530_v59, 0.0  ;;  %v623_v59 = vadd.f32 %v2415_v48, %v2325_v7  ;;  %v2466_v47 = vpack.c.bf16 %v824_v41, %v823_v55  ;;  %v832_v7 = vmax.f32 %v625_v33, 0.0 }
 0x1b2   :  { %v610_v55 = vadd.f32 %v2415_v48, %v2383_v31 }
 0x1b3   :  { %v2434_v49 = vpack.c.bf16 %v794_v27, %v793_v53  ;;  %v831_v2 = vmax.f32 %v623_v59, 0.0 }
 0x1b4   :  { %v637_v53 = vpop.f32.mrf.mxu2 }
 0x1b5   :  { %v923_v9 = vpack.c.bf16 %v832_v7, %v831_v2  ;;  %v638_v25 = vadd.f32 %v2415_v48, %v637_v53  ;;  %v738_v7 = vadd.f32 %v2415_v48, %v2395_v12 }
 0x1b6   :  { %1231 = vmatpush.bf16.xpose.msrb.mxu1 %v1103_v56  ;;  %v532_v4 = vpop.f32.mrf.mxu0  ;;  %1166 = vmatpush.bf16.xpose.msrb.mxu2 %v983_v0  ;;  %v730_v56 = vadd.f32 %v2415_v48, %v2341_v18  ;;  %v1070_v18 = vsel %vm235_vm0, %v924_v57, 0  ;;  %v2477_v27 = vpop.f32.mrf.mxu3  ;;  %v828_v57 = vmax.f32 %v615_v24, 0.0 }
 0x1b7   :  { %v533_v38 = vadd.f32 %v2415_v48, %v532_v4  ;;  %v1067_v37 = vsel %vm235_vm0, %v923_v9, 0  ;;  %v613_v4 = vadd.f32 %v2415_v48, %v2403_v58  ;;  %v876_v58 = vmax.f32 %v735_v45, 0.0 }
 0x1b8   :  { %v874_v16 = vmax.f32 %v730_v56, 0.0  ;;  %v877_v36 = vmax.f32 %v738_v7, 0.0 }
 0x1b9   :  { %v795_v63 = vmax.f32 %v533_v38, 0.0  ;;  %v827_v44 = vmax.f32 %v613_v4, 0.0 }
 0x1ba   :  { %v2470_v26 = vpack.c.bf16 %v874_v16, %v873_v17  ;;  %v826_v17 = vmax.f32 %v610_v55, 0.0 }
 0x1bb   :  { %v921_v59 = vpack.c.bf16 %v828_v57, %v827_v44 }
 0x1bc   :  { %v639_v14 = vpop.f32.mrf.mxu2 }
 0x1bd   :  { %v1061_v16 = vsel %vm235_vm0, %v921_v59, 0 }
 0x1be   :  { %1232 = vmatpush.bf16.xpose.msrb.mxu1 %v1100_v5  ;;  %v534_v19 = vpop.f32.mrf.mxu0  ;;  %1167 = vmatpush.bf16.xpose.msrb.mxu2 %v980_v13  ;;  %v749_v15 = vpop.f32.mrf.mxu3 }
 0x1bf   :  { %v535_v60 = vadd.f32 %v2415_v48, %v534_v19  ;;  %v875_v19 = vmax.f32 %v733_v10, 0.0  ;;  %v1055_v10 = vsel %vm235_vm0, %v2466_v47, 0 }
 0x1c1   :  { %v796_v35 = vmax.f32 %v535_v60, 0.0  ;;  %v837_v60 = vmax.f32 %v638_v25, 0.0  ;;  %v2495_v56 = vpack.c.bf16 %v876_v58, %v875_v19 }
 0x1c3   :  { %v2468_v5 = vpack.c.bf16 %v796_v35, %v795_v63  ;;  %v608_v35 = vadd.f32 %v2415_v48, %v2373_v21  ;;  %v740_v21 = vadd.f32 %v2415_v48, %v2407_v8 }
 0x1c5   :  { %1528 = vmatmul.msk.bf16.vlgmr.msrb.gmra.mxu1 %vm235_vm0, %v2248_v43  ;;  %1523 = vmatmul.msk.bf16.vlgmr.msrb.gmra.mxu2 %vm235_vm0, %v2248_v43  ;;  %v825_v33 = vmax.f32 %v608_v35, 0.0  ;;  %v878_v53 = vmax.f32 %v740_v21, 0.0  ;;  %v1052_v35 = vsel %vm235_vm0, %v2432_v22, 0 }
 0x1c6   :  { %1199 = vmatpush.bf16.xpose.msra.mxu2 %v1073_v52  ;;  %v537_v6 = vpop.f32.mrf.mxu0  ;;  %v640_v52 = vadd.f32 %v2415_v48, %v639_v14 }
 0x1c7   :  { %v538_v20 = vadd.f32 %v2415_v48, %v537_v6  ;;  %v920_v6 = vpack.c.bf16 %v826_v17, %v825_v33  ;;  %v946_v11 = vpack.c.bf16 %v878_v53, %v877_v36 }
 0x1c8   :  { %v838_v61 = vmax.f32 %v640_v52, 0.0 }
 0x1c9   :  { %v797_v38 = vmax.f32 %v538_v20, 0.0  ;;  %v1058_v20 = vsel %vm235_vm0, %v920_v6, 0 }
 0x1ca   :  { %v2497_v51 = vpack.c.bf16 %v838_v61, %v837_v60 }
 0x1cc   :  { %v642_v41 = vpop.f32.mrf.mxu2 }
 0x1cd   :  { %v643_v31 = vadd.f32 %v2415_v48, %v642_v41 }
 0x1ce   :  { %1200 = vmatpush.bf16.xpose.msra.mxu2 %v1070_v18  ;;  %v539_v23 = vpop.f32.mrf.mxu0  ;;  %v752_v18 = vpop.f32.mrf.mxu3 }
 0x1cf   :  { %v540_v0 = vadd.f32 %v2415_v48, %v539_v23  ;;  %v839_v9 = vmax.f32 %v643_v31, 0.0  ;;  %v753_v4 = vadd.f32 %v2415_v48, %v752_v18 }
 0x1d1   :  { %v798_v13 = vmax.f32 %v540_v0, 0.0  ;;  %v883_v24 = vmax.f32 %v753_v4, 0.0  ;;  %v1136_v4 = vsel %vm235_vm0, %v946_v11, 0  ;;  %v1013_v11 = vsel %vm235_vm0, %v2468_v5, 0 }
 0x1d3   :  { %v2492_v29 = vpack.c.bf16 %v798_v13, %v797_v38  ;;  %v748_v38 = vadd.f32 %v2415_v48, %v2477_v27  ;;  %v750_v13 = vadd.f32 %v2415_v48, %v749_v15  ;;  %v743_v27 = vadd.f32 %v2415_v48, %v2438_v28 }
 0x1d4   :  { %v644_v2 = vpop.f32.mrf.mxu2  ;;  %v745_v15 = vadd.f32 %v2415_v48, %v2451_v40 }
 0x1d5   :  { %v645_v3 = vadd.f32 %v2415_v48, %v644_v2  ;;  %v882_v44 = vmax.f32 %v750_v13, 0.0  ;;  %v879_v59 = vmax.f32 %v743_v27, 0.0 }
 0x1d6   :  { %1201 = vmatpush.bf16.xpose.msra.mxu2 %v1067_v37  ;;  %v2499_v63 = vpop.f32.mrf.mxu0  ;;  %v754_v0 = vpop.f32.mrf.mxu3  ;;  %v880_v33 = vmax.f32 %v745_v15, 0.0 }
 0x1d7   :  { %v840_v34 = vmax.f32 %v645_v3, 0.0  ;;  %v755_v8 = vadd.f32 %v2415_v48, %v754_v0 }
 0x1d8   :  { %v947_v2 = vpack.c.bf16 %v880_v33, %v879_v59  ;;  %v1156_v59 = vpop.f32.mrf.mxu1 }
 0x1d9   :  { %v2515_v23 = vpack.c.bf16 %v840_v34, %v839_v9  ;;  %v884_v54 = vmax.f32 %v755_v8, 0.0  ;;  %v543_v34 = vadd.f32 %v2415_v48, %v2499_v63  ;;  %v1016_v63 = vsel %vm235_vm0, %v2492_v29, 0 }
 0x1da   :  { %v1139_v3 = vsel %vm235_vm0, %v947_v2, 0  ;;  %v1124_v29 = vsel %vm235_vm0, %v2399_v46, 0 }
 0x1db   :  { %v949_v19 = vpack.c.bf16 %v884_v54, %v883_v24 }
 0x1dc   :  { %v647_v12 = vpop.f32.mrf.mxu2 }
 0x1dd   :  { %v648_v25 = vadd.f32 %v2415_v48, %v647_v12  ;;  %v1145_v47 = vsel %vm235_vm0, %v949_v19, 0  ;;  %v799_v12 = vmax.f32 %v543_v34, 0.0 }
 0x1de   :  { %1202 = vmatpush.bf16.xpose.msra.mxu2 %v1064_v62  ;;  %v2506_v1 = vpop.f32.mrf.mxu0  ;;  %v881_v62 = vmax.f32 %v748_v38, 0.0 }
 0x1df   :  { %v841_v58 = vmax.f32 %v648_v25, 0.0  ;;  %v545_v53 = vadd.f32 %v2415_v48, %v2506_v1  ;;  %v1133_v1 = vsel %vm235_vm0, %v2495_v56, 0  ;;  %v1010_v56 = vsel %vm235_vm0, %v2434_v49, 0 }
 0x1e0   :  { %v948_v55 = vpack.c.bf16 %v882_v44, %v881_v62  ;;  %v1097_v49 = vsel %vm235_vm0, %v2074_v32, 0 }
 0x1e2   :  { %v1142_v17 = vsel %vm235_vm0, %v948_v55, 0 }
 0x1e4   :  { %v649_v45 = vpop.f32.mrf.mxu2 }
 0x1e5   :  { %v650_v52 = vadd.f32 %v2415_v48, %v649_v45  ;;  %v1127_v45 = vsel %vm235_vm0, %v2436_v50, 0  ;;  %v1004_v50 = vsel %vm235_vm0, %v2375_v30, 0 }
 0x1e6   :  { %1203 = vmatpush.bf16.xpose.msra.mxu2 %v1061_v16  ;;  %v547_v37 = vpop.f32.mrf.mxu0 }
 0x1e7   :  { %v842_v60 = vmax.f32 %v650_v52, 0.0  ;;  %v548_v40 = vadd.f32 %v2415_v48, %v547_v37 }
 0x1e9   :  { %v2526_v61 = vpack.c.bf16 %v842_v60, %v841_v58  ;;  %v801_v36 = vmax.f32 %v548_v40, 0.0 }
 0x1ec   :  { %v652_v37 = vpop.f32.mrf.mxu2 }
 0x1ee   :  { %1204 = vmatpush.bf16.xpose.msra.mxu2 %v1058_v20  ;;  %v549_v14 = vpop.f32.mrf.mxu0  ;;  %v800_v20 = vmax.f32 %v545_v53, 0.0 }
 0x1ef   :  { %v550_v18 = vadd.f32 %v2415_v48, %v549_v14  ;;  %v1130_v14 = vsel %vm235_vm0, %v2470_v26, 0  ;;  %v1007_v26 = vsel %vm235_vm0, %v2397_v42, 0  ;;  %v1094_v42 = vsel %vm235_vm0, %v2022_v39, 0 }
 0x1f0   :  { %v907_v8 = vpack.c.bf16 %v800_v20, %v799_v12 }
 0x1f1   :  { %v802_v21 = vmax.f32 %v550_v18, 0.0  ;;  %v1076_v18 = vsel %vm235_vm0, %v2497_v51, 0 }
 0x1f2   :  { %v1019_v24 = vsel %vm235_vm0, %v907_v8, 0 }
 0x1f3   :  { %v908_v9 = vpack.c.bf16 %v802_v21, %v801_v36 }
 0x1f4   :  { %v654_v54 = vpop.f32.mrf.mxu2 }
 0x1f5   :  { %v1022_v0 = vsel %vm235_vm0, %v908_v9, 0 }
 0x1f6   :  { %1205 = vmatpush.bf16.xpose.msra.mxu2 %v1055_v10  ;;  %v552_v57 = vpop.f32.mrf.mxu0 }
 0x1f7   :  { %v553_v41 = vadd.f32 %v2415_v48, %v552_v57  ;;  %v655_v57 = vadd.f32 %v2415_v48, %v654_v54 }
 0x1f9   :  { %v803_v28 = vmax.f32 %v553_v41, 0.0  ;;  %v844_v39 = vmax.f32 %v655_v57, 0.0 }
 0x1fc   :  { %v657_v10 = vpop.f32.mrf.mxu2 }
 0x1fd   :  { %v658_v30 = vadd.f32 %v2415_v48, %v657_v10 }
 0x1fe   :  { %1206 = vmatpush.bf16.xpose.msra.mxu2 %v1052_v35  ;;  %v554_v16 = vpop.f32.mrf.mxu0 }
 0x1ff   :  { %v555_v22 = vadd.f32 %v2415_v48, %v554_v16  ;;  %v845_v60 = vmax.f32 %v658_v30, 0.0  ;;  %v1158_v16 = vpop.f32.mrf.mxu1 }
 0x201   :  { %v804_v6 = vmax.f32 %v555_v22, 0.0 }
 0x203   :  { %v909_v7 = vpack.c.bf16 %v804_v6, %v803_v28  ;;  %v2597_v28 = vstv %s2648_s4  ;;  %s1607_s4 = smov [#allocation3]  }
 0x204   :  { %v659_v25 = vpop.f32.mrf.mxu2  ;;  %v1157_v6 = vadd.f32 %v1156_v59, %v2597_v28  ;;  %s1439_s23 = sshll.u32 %s1607_s4, 4  ;;  %s1440_s23 = int_to_ptr.vmem [resolvable:$true] %s1439_s23 }
 0x205   :  { %1526 = vmatmul.msk.bf16.vlgmr.msra.gmra.mxu2 %vm235_vm0, %v2248_v43  ;;  %v1025_v31 = vsel %vm235_vm0, %v909_v7, 0  ;;  %v660_v58 = vadd.f32 %v2415_v48, %v659_v25 }
 0x206   :  { %1238 = vmatpush.bf16.xpose.msrb.mxu2 %v1145_v47  ;;  %1173 = vmatpush.bf16.xpose.msrb.mxu3 %v1025_v31  ;;  %v653_v47 = vadd.f32 %v2415_v48, %v652_v37  ;;  %v1530_v40 = vmul.f32 -1.442695, %v1157_v6 }
 0x207   :  { %v846_v62 = vmax.f32 %v660_v58, 0.0  ;;  %v1195_v34 = vpop.f32.mrf.mxu1 }
 0x208   :  { %v843_v27 = vmax.f32 %v653_v47, 0.0  ;;  %v1196_v54 = vadd.f32 %v1195_v34, %v2597_v28 }
 0x209   :  { %v930_v35 = vpack.c.bf16 %v846_v62, %v845_v60 }
 0x20a   :  { %v929_v55 = vpack.c.bf16 %v844_v39, %v843_v27 }
 0x20b   :  { %v1088_v15 = vsel %vm235_vm0, %v930_v35, 0 }
 0x20c   :  { %v1085_v41 = vsel %vm235_vm0, %v929_v55, 0 }
 0x20e   :  { %1239 = vmatpush.bf16.xpose.msrb.mxu2 %v1142_v17  ;;  %1174 = vmatpush.bf16.xpose.msrb.mxu3 %v1022_v0  ;;  %v1082_v17 = vsel %vm235_vm0, %v2526_v61, 0 }
 0x213   :  { %v662_v52 = vpop.f32.mrf.mxu2 }
 0x214   :  { %v663_v46 = vadd.f32 %v2415_v48, %v662_v52  ;;  %v1533_v52 = vmul.f32 -1.442695, %v1196_v54 }
 0x216   :  { %1240 = vmatpush.bf16.xpose.msrb.mxu2 %v1139_v3  ;;  %1175 = vmatpush.bf16.xpose.msrb.mxu3 %v1019_v24  ;;  %v847_v13 = vmax.f32 %v663_v46, 0.0 }
 0x21b   :  { %v664_v5 = vpop.f32.mrf.mxu2 }
 0x21c   :  { %v665_v38 = vadd.f32 %v2415_v48, %v664_v5  ;;  %v1079_v48 = vsel %vm235_vm0, %v2515_v23, 0 }
 0x21e   :  { %1241 = vmatpush.bf16.xpose.msrb.mxu2 %v1136_v4  ;;  %1176 = vmatpush.bf16.xpose.msrb.mxu3 %v1016_v63  ;;  %v848_v19 = vmax.f32 %v665_v38, 0.0  ;;  %v1197_v63 = vpop.f32.mrf.mxu1 }
 0x220   :  { %v931_v32 = vpack.c.bf16 %v848_v19, %v847_v13 }
 0x222   :  { %v1091_v44 = vsel %vm235_vm0, %v931_v32, 0 }
 0x226   :  { %1242 = vmatpush.bf16.xpose.msrb.mxu2 %v1133_v1  ;;  %1177 = vmatpush.bf16.xpose.msrb.mxu3 %v1013_v11 }
 0x22e   :  { %1243 = vmatpush.bf16.xpose.msrb.mxu2 %v1130_v14  ;;  %1178 = vmatpush.bf16.xpose.msrb.mxu3 %v1010_v56 }
 0x236   :  { %1244 = vmatpush.bf16.xpose.msrb.mxu2 %v1127_v45  ;;  %1179 = vmatpush.bf16.xpose.msrb.mxu3 %v1007_v26 }
 0x23e   :  { %1245 = vmatpush.bf16.xpose.msrb.mxu2 %v1124_v29  ;;  %1180 = vmatpush.bf16.xpose.msrb.mxu3 %v1004_v50 }
 0x242   :  { %v1234_v47 = vpop.f32.mrf.mxu1 }
 0x245   :  { %1529 = vmatmul.msk.bf16.vlgmr.msrb.gmra.mxu2 %vm235_vm0, %v2248_v43  ;;  %1524 = vmatmul.msk.bf16.vlgmr.msrb.gmra.mxu3 %vm235_vm0, %v2248_v43 }
 0x246   :  { %1212 = vmatpush.bf16.xpose.msra.mxu3 %v1097_v49 }
 0x248   :  { %v1169_v33 = vpop.f32.mrf.mxu2 }
 0x249   :  { %v1170_v61 = vadd.f32 %v1169_v33, %v2597_v28 }
 0x24a   :  { %v1236_v59 = vpop.f32.mrf.mxu1 }
 0x24b   :  { %v1531_v2 = vmul.f32 -1.442695, %v1170_v61 }
 0x24d   :  { %1548 = vpow2.f32 %v1531_v2 }
 0x24e   :  { %1213 = vmatpush.bf16.xpose.msra.mxu3 %v1094_v42  ;;  %1550 = vpow2.f32 %v1530_v40 }
 0x250   :  { %v1171_v22 = vpop.f32.mrf.mxu2 }
 0x253   :  { %v1549_v23 = vpop.eup %1548 }
 0x254   :  { %v1551_v7 = vpop.eup %1550  ;;  %v1276_v51 = vadd.f32 1.0, %v1549_v23 }
 0x255   :  { %v1275_v21 = vadd.f32 1.0, %v1551_v7 }
 0x256   :  { %1214 = vmatpush.bf16.xpose.msra.mxu3 %v1091_v44  ;;  %1552 = vrcp.f32 %v1276_v51  ;;  %vm1303_vm1 = vweird.f32 %v1276_v51  ;;  %v1309_v0 = vand.u32 2147483648, %v1276_v51  ;;  %v1307_v24 = vand.u32 2147483647, %v1276_v51 }
 0x257   :  { %1554 = vrcp.f32 %v1275_v21  ;;  %vm1288_vm4 = vweird.f32 %v1275_v21  ;;  %v1294_v1 = vand.u32 2147483648, %v1275_v21  ;;  %v1292_v10 = vand.u32 2147483647, %v1275_v21 }
 0x258   :  { %v1310_v4 = vor.u32 1.1754944e-38, %v1309_v0  ;;  %vm1308_vm7 = vcmp.eq.f32.partialorder %v1307_v24, 8.507059e+37  ;;  %1556 = vpow2.f32 %v1533_v52 }
 0x259   :  { %v1295_v45 = vor.u32 1.1754944e-38, %v1294_v1  ;;  %vm1293_vm8 = vcmp.eq.f32.partialorder %v1292_v10, 8.507059e+37 }
 0x25e   :  { %1215 = vmatpush.bf16.xpose.msra.mxu3 %v1088_v15 }
 0x266   :  { %1216 = vmatpush.bf16.xpose.msra.mxu3 %v1085_v41 }
 0x26e   :  { %1217 = vmatpush.bf16.xpose.msra.mxu3 %v1082_v17 }
 0x276   :  { %1218 = vmatpush.bf16.xpose.msra.mxu3 %v1079_v48 }
 0x27e   :  { %1219 = vmatpush.bf16.xpose.msra.mxu3 %v1076_v18 }
 0x285   :  { %1527 = vmatmul.msk.bf16.vlgmr.msra.gmra.mxu3 %vm235_vm0, %v2248_v43  ;;  %v1553_v43 = vpop.eup %1552 }
 0x286   :  { %v1555_v31 = vpop.eup %1554  ;;  %v1299_v3 = vmul.f32 %v1553_v43, %v1276_v51  ;;  %vm1304_vm2 = vweird.f32 %v1553_v43 }
 0x287   :  { %v1284_v36 = vmul.f32 %v1555_v31, %v1275_v21  ;;  %vm2601_vm3 = vmor %vm1303_vm1, %vm1304_vm2  ;;  %vm1289_vm5 = vweird.f32 %v1555_v31  ;;  %v1557_v49 = vpop.eup %1556  ;;  %vm1420_vm2 = vcmask 1042434  }
 0x288   :  { %v1300_v53 = vsub.f32 1.0, %v1299_v3  ;;  %vm1290_vm6 = vmor %vm1288_vm4, %vm1289_vm5  ;;  %v1278_v5 = vadd.f32 1.0, %v1557_v49  ;;  %v1208_v46 = vpop.f32.mrf.mxu2 }
 0x289   :  { %v1285_v9 = vsub.f32 1.0, %v1284_v36 }
 0x28a   :  { %v1301_v20 = vmul.f32 %v1553_v43, %v1300_v53  ;;  %1558 = vrcp.f32 %v1278_v5  ;;  %vm1333_vm10 = vweird.f32 %v1278_v5  ;;  %v1339_v27 = vand.u32 2147483648, %v1278_v5 }
 0x28b   :  { %v1286_v37 = vmul.f32 %v1555_v31, %v1285_v9  ;;  %v1337_v15 = vand.u32 2147483647, %v1278_v5  ;;  %v1209_v9 = vadd.f32 %v1208_v46, %v2597_v28 }
 0x28c   :  { %v1302_v8 = vadd.f32 %v1553_v43, %v1301_v20  ;;  %v1340_v22 = vor.u32 1.1754944e-38, %v1339_v27 }
 0x28d   :  { %v1287_v14 = vadd.f32 %v1555_v31, %v1286_v37  ;;  %vm1338_vm13 = vcmp.eq.f32.partialorder %v1337_v15, 8.507059e+37  ;;  %v1534_v0 = vmul.f32 -1.442695, %v1209_v9 }
 0x28e   :  { %v1306_v11 = vsel %vm2601_vm3, %v1553_v43, %v1302_v8  ;;  %vm1422_vm3 = vcmask 1041408  }
 0x28f   :  { %v1291_v25 = vsel %vm1290_vm6, %v1555_v31, %v1287_v14  ;;  %v1311_v56 = vsel %vm1308_vm7, %v1310_v4, %v1306_v11  ;;  %v1235_v31 = vadd.f32 %v1234_v47, %v2597_v28 }
 0x290   :  { %v1296_v29 = vsel %vm1293_vm8, %v1295_v45, %v1291_v25  ;;  %v1411_v26 = vrot.slane %v1311_v56, 7  ;;  %v1210_v13 = vpop.f32.mrf.mxu2  ;;  %v1559_v19 = vpop.eup %1558 }
 0x291   :  { %v1329_v58 = vmul.f32 %v1559_v19, %v1278_v5  ;;  %vm1334_vm11 = vweird.f32 %v1559_v19  ;;  %v1536_v34 = vmul.f32 -1.442695, %v1235_v31 }
 0x292   :  { %v1419_v50 = vsel %vm1418_vm9, %v1296_v29, %v1411_v26  ;;  %vm2609_vm12 = vmor %vm1333_vm10, %vm1334_vm11 }
 0x293   :  { %v1330_v60 = vsub.f32 1.0, %v1329_v58 }
 0x295   :  { %v1331_v35 = vmul.f32 %v1559_v19, %v1330_v60 }
 0x297   :  { %v1332_v39 = vadd.f32 %v1559_v19, %v1331_v35 }
 0x299   :  { %v1336_v48 = vsel %vm2609_vm12, %v1559_v19, %v1332_v39 }
 0x29a   :  { %v1341_v40 = vsel %vm1338_vm13, %v1340_v22, %v1336_v48 }
 0x29b   :  { %v1413_v51 = vrot.slane %v1341_v40, 5 }
 0x2c8   :  { %v1182_v38 = vpop.f32.mrf.mxu3  ;;  %v1247_v57 = vpop.f32.mrf.mxu2 }
 0x2c9   :  { %v1183_v42 = vadd.f32 %v1182_v38, %v2597_v28  ;;  %v1248_v36 = vadd.f32 %v1247_v57, %v2597_v28 }
 0x2cb   :  { %v1532_v30 = vmul.f32 -1.442695, %v1183_v42  ;;  %v1537_v20 = vmul.f32 -1.442695, %v1248_v36 }
 0x2cd   :  { %1560 = vpow2.f32 %v1532_v30 }
 0x2d0   :  { %v1184_v32 = vpop.f32.mrf.mxu3  ;;  %v1249_v33 = vpop.f32.mrf.mxu2 }
 0x2d3   :  { %v1561_v62 = vpop.eup %1560 }
 0x2d4   :  { %v1277_v44 = vadd.f32 1.0, %v1561_v62 }
 0x2d6   :  { %1562 = vrcp.f32 %v1277_v44  ;;  %v1324_v16 = vand.u32 2147483648, %v1277_v44  ;;  %vm1318_vm14 = vweird.f32 %v1277_v44  ;;  %v1322_v61 = vand.u32 2147483647, %v1277_v44 }
 0x2d7   :  { %1564 = vpow2.f32 %v1536_v34 }
 0x2d8   :  { %v1325_v2 = vor.u32 1.1754944e-38, %v1324_v16  ;;  %vm1323_vm1 = vcmp.eq.f32.partialorder %v1322_v61, 8.507059e+37  ;;  %1566 = vpow2.f32 %v1537_v20 }
 0x2d9   :  { %1568 = vpow2.f32 %v1534_v0 }
 0x2dc   :  { %v1563_v41 = vpop.eup %1562 }
 0x2dd   :  { %v1314_v17 = vmul.f32 %v1563_v41, %v1277_v44  ;;  %vm1319_vm15 = vweird.f32 %v1563_v41  ;;  %v1565_v37 = vpop.eup %1564 }
 0x2de   :  { %vm1320_vm0 = vmor %vm1318_vm14, %vm1319_vm15  ;;  %v1567_v12 = vpop.eup %1566  ;;  %v1281_v8 = vadd.f32 1.0, %v1565_v37 }
 0x2df   :  { %v1315_v18 = vsub.f32 1.0, %v1314_v17  ;;  %v1569_v4 = vpop.eup %1568  ;;  %v1282_v24 = vadd.f32 1.0, %v1567_v12 }
 0x2e0   :  { %v1279_v54 = vadd.f32 1.0, %v1569_v4  ;;  %1570 = vrcp.f32 %v1281_v8  ;;  %vm1378_vm4 = vweird.f32 %v1281_v8  ;;  %v1382_v32 = vand.u32 2147483647, %v1281_v8 }
 0x2e1   :  { %v1316_v6 = vmul.f32 %v1563_v41, %v1315_v18  ;;  %1572 = vrcp.f32 %v1282_v24  ;;  %vm1393_vm7 = vweird.f32 %v1282_v24  ;;  %v1399_v19 = vand.u32 2147483648, %v1282_v24 }
 0x2e2   :  { %1574 = vrcp.f32 %v1279_v54  ;;  %vm1348_vm6 = vweird.f32 %v1279_v54  ;;  %v1397_v62 = vand.u32 2147483647, %v1282_v24  ;;  %v1354_v47 = vand.u32 2147483648, %v1279_v54 }
 0x2e3   :  { %v1317_v23 = vadd.f32 %v1563_v41, %v1316_v6  ;;  %v1352_v15 = vand.u32 2147483647, %v1279_v54  ;;  %vm1383_vm13 = vcmp.eq.f32.partialorder %v1382_v32, 8.507059e+37 }
 0x2e4   :  { %vm1398_vm14 = vcmp.eq.f32.partialorder %v1397_v62, 8.507059e+37  ;;  %v1355_v16 = vor.u32 1.1754944e-38, %v1354_v47 }
 0x2e5   :  { %v1321_v7 = vsel %vm1320_vm0, %v1563_v41, %v1317_v23  ;;  %v1400_v41 = vor.u32 1.1754944e-38, %v1399_v19  ;;  %vm1353_vm0 = vcmp.eq.f32.partialorder %v1352_v15, 8.507059e+37 }
 0x2e6   :  { %v1326_v21 = vsel %vm1323_vm1, %v1325_v2, %v1321_v7  ;;  %v1571_v14 = vpop.eup %1570 }
 0x2e7   :  { %v1412_v43 = vrot.slane %v1326_v21, 6  ;;  %v1573_v11 = vpop.eup %1572  ;;  %v1374_v25 = vmul.f32 %v1571_v14, %v1281_v8  ;;  %vm1379_vm5 = vweird.f32 %v1571_v14 }
 0x2e8   :  { %v1575_v45 = vpop.eup %1574  ;;  %v1389_v56 = vmul.f32 %v1573_v11, %v1282_v24  ;;  %vm1394_vm8 = vweird.f32 %v1573_v11  ;;  %vm2621_vm10 = vmor %vm1378_vm4, %vm1379_vm5  ;;  %vm1424_vm4 = vcmask 1044484   ;;  %vm1426_vm5 = vcmask 1046534  }
 0x2e9   :  { %v1421_v3 = vsel %vm1420_vm2, %v1412_v43, %v1413_v51  ;;  %v1344_v29 = vmul.f32 %v1575_v45, %v1279_v54  ;;  %v1375_v52 = vsub.f32 1.0, %v1374_v25  ;;  %vm1349_vm9 = vweird.f32 %v1575_v45  ;;  %vm2625_vm11 = vmor %vm1393_vm7, %vm1394_vm8 }
 0x2ea   :  { %v2617_v53 = vsel %vm1422_vm3, %v1419_v50, %v1421_v3  ;;  %v1390_v49 = vsub.f32 1.0, %v1389_v56  ;;  %vm2630_vm12 = vmor %vm1348_vm6, %vm1349_vm9  ;;  %vm1428_vm6 = vcmask 1045508   ;;  %vm1430_vm7 = vcmask 1043456  }
 0x2eb   :  { %v1345_v5 = vsub.f32 1.0, %v1344_v29  ;;  %v1376_v38 = vmul.f32 %v1571_v14, %v1375_v52 }
 0x2ec   :  { %v1391_v42 = vmul.f32 %v1573_v11, %v1390_v49 }
 0x2ed   :  { %v1346_v13 = vmul.f32 %v1575_v45, %v1345_v5  ;;  %v1377_v30 = vadd.f32 %v1571_v14, %v1376_v38 }
 0x2ee   :  { %v1392_v60 = vadd.f32 %v1573_v11, %v1391_v42 }
 0x2ef   :  { %v1347_v35 = vadd.f32 %v1575_v45, %v1346_v13  ;;  %v1381_v59 = vsel %vm2621_vm10, %v1571_v14, %v1377_v30 }
 0x2f0   :  { %v1396_v17 = vsel %vm2625_vm11, %v1573_v11, %v1392_v60 }
 0x2f1   :  { %v1351_v48 = vsel %vm2630_vm12, %v1575_v45, %v1347_v35  ;;  %v1401_v2 = vsel %vm1398_vm14, %v1400_v41, %v1396_v17 }
 0x2f2   :  { %v1356_v7 = vsel %vm1353_vm0, %v1355_v16, %v1351_v48  ;;  %v1417_v43 = vrot.slane %v1401_v2, 1 }
 0x2f3   :  { %v1414_v3 = vrot.slane %v1356_v7, 4 }
 0x308   :  { %v1221_v1 = vpop.f32.mrf.mxu3 }
 0x309   :  { %v1222_v63 = vadd.f32 %v1221_v1, %v2597_v28  ;;  %v1384_v28 = vand.u32 2147483648, %v1281_v8 }
 0x30b   :  { %v1535_v10 = vmul.f32 -1.442695, %v1222_v63  ;;  %v1385_v55 = vor.u32 1.1754944e-38, %v1384_v28 }
 0x30d   :  { %1576 = vpow2.f32 %v1535_v10  ;;  %v1386_v6 = vsel %vm1383_vm13, %v1385_v55, %v1381_v59 }
 0x30e   :  { %v1416_v21 = vrot.slane %v1386_v6, 2 }
 0x310   :  { %v1223_v26 = vpop.f32.mrf.mxu3  ;;  %v1427_v34 = vsel %vm1426_vm5, %v1416_v21, %v1417_v43 }
 0x313   :  { %v1577_v50 = vpop.eup %1576 }
 0x314   :  { %v1280_v46 = vadd.f32 1.0, %v1577_v50 }
 0x316   :  { %1578 = vrcp.f32 %v1280_v46  ;;  %v1369_v22 = vand.u32 2147483648, %v1280_v46  ;;  %v1367_v61 = vand.u32 2147483647, %v1280_v46  ;;  %vm1363_vm1 = vweird.f32 %v1280_v46 }
 0x318   :  { %v1370_v23 = vor.u32 1.1754944e-38, %v1369_v22  ;;  %vm1368_vm3 = vcmp.eq.f32.partialorder %v1367_v61, 8.507059e+37 }
 0x31c   :  { %v1579_v44 = vpop.eup %1578 }
 0x31d   :  { %v1359_v39 = vmul.f32 %v1579_v44, %v1280_v46  ;;  %vm1364_vm15 = vweird.f32 %v1579_v44 }
 0x31e   :  { %vm1365_vm2 = vmor %vm1363_vm1, %vm1364_vm15 }
 0x31f   :  { %v1360_v33 = vsub.f32 1.0, %v1359_v39 }
 0x321   :  { %v1361_v18 = vmul.f32 %v1579_v44, %v1360_v33 }
 0x323   :  { %v1362_v40 = vadd.f32 %v1579_v44, %v1361_v18 }
 0x325   :  { %v1366_v51 = vsel %vm1365_vm2, %v1579_v44, %v1362_v40 }
 0x326   :  { %v1371_v31 = vsel %vm1368_vm3, %v1370_v23, %v1366_v51 }
 0x327   :  { %v1415_v36 = vrot.slane %v1371_v31, 3 }
 0x329   :  { %v1425_v9 = vsel %vm1424_vm4, %v1414_v3, %v1415_v36 }
 0x32a   :  { %v1429_v20 = vsel %vm1428_vm6, %v1425_v9, %v1427_v34 }
 0x32b   :  { %v1431_v0 = vsel %vm1430_vm7, %v2617_v53, %v1429_v20 }
 0x32c   :  { %1433 = vst [vmem:[#allocation3] sm:$0xff] %v1431_v0 }
 0x32d   :  { %1444 = dma.vmem_to_hbm [thread:$0]  %s1440_s23, 128, %s1442_s25, [#allocation4]  }
 0x32e   :  { %1605 = dma.done.wait [#allocation4], 128  }
 0x32f   :  { %1606 = vsyncadd [#allocation4], 4294967168 }
 0x330   :  { %1449 = vsyncpa [#allocation4], 1 }

</bundles_post_ra>
